<compile_context>
chip_gen: v5e
topology: v5e:2x2
jax: 0.10.0
libtpu: 0.0.40
codegen_flags: <defaults>
</compile_context>

<pallas_src>
import jax
import jax.numpy as jnp
from jax.experimental import pallas as pl
from jax.experimental.pallas import tpu as pltpu


# ----------------------------- Pallas kernel ---------------------------------
def neumf_kernel(users_ref, items_ref,               # scalar-prefetch ids (SMEM)
                 user_tab_ref, item_tab_ref,         # HBM tables (pl.ANY)
                 w1u_ref, w1i_ref, b1_ref,           # MLP layer 1 (bf16 W, f32 b)
                 w2_ref, b2_ref,                     # MLP layer 2
                 wpm_ref, wpg_ref, bp_ref,           # prediction layer (rows + SMEM bias)
                 out_ref,                            # (TB, 128) lane-dense output
                 ubuf_ref, ibuf_ref, sem):           # VMEM gather scratch + DMA sems
    f32 = jnp.float32
    bf16 = jnp.bfloat16
    tb = out_ref.shape[0]
    n_gmf = wpg_ref.shape[1]                         # GMF embedding width (= n_factors)
    base = pl.program_id(0) * tb

    # ---- Gather: per-row DMA from the HBM tables into VMEM scratch ------------
    # (padded rows beyond the real batch use id 0, which is always in range; the
    #  wrapper slices them away.  Ids are assumed in-range, as torch.Embedding
    #  would require.)
    @pl.loop(0, tb)
    def _(r):
        uid = users_ref[base + r]
        iid = items_ref[base + r]
        pltpu.make_async_copy(user_tab_ref.at[pl.ds(uid, 1)],
                              ubuf_ref.at[pl.ds(r, 1)], sem.at[0]).start()
        pltpu.make_async_copy(item_tab_ref.at[pl.ds(iid, 1)],
                              ibuf_ref.at[pl.ds(r, 1)], sem.at[1]).start()

    @pl.loop(0, tb)
    def _(r):
        # Only the copy *shape* matters for the wait; all row copies are identical.
        pltpu.make_async_copy(user_tab_ref.at[pl.ds(0, 1)],
                              ubuf_ref.at[pl.ds(0, 1)], sem.at[0]).wait()
        pltpu.make_async_copy(item_tab_ref.at[pl.ds(0, 1)],
                              ibuf_ref.at[pl.ds(0, 1)], sem.at[1]).wait()

    u_rows = ubuf_ref[...]                           # (tb, n_gmf + n_mlp) f32
    i_rows = ibuf_ref[...]

    # ---- GMF branch: elementwise product (VPU, f32) ---------------------------
    gmf_vec = u_rows[:, :n_gmf] * i_rows[:, :n_gmf]  # (tb, F) f32

    # ---- MLP branch: concat@W1 split into two bf16 matmuls (MXU, f32 acc) -----
    mlp_u = u_rows[:, n_gmf:].astype(bf16)           # (tb, Fm)
    mlp_i = i_rows[:, n_gmf:].astype(bf16)
    h = (jnp.dot(mlp_u, w1u_ref[...], preferred_element_type=f32)
         + jnp.dot(mlp_i, w1i_ref[...], preferred_element_type=f32)
         + b1_ref[...])
    h = jnp.maximum(h, 0.0)                          # ReLU (f32)
    h = jnp.dot(h.astype(bf16), w2_ref[...], preferred_element_type=f32) + b2_ref[...]
    h = jnp.maximum(h, 0.0)                          # (tb, F) f32

    # ---- NeuMF head: concat([MLP, GMF]) @ Wp + bp as VPU mul + lane reduce ----
    logit = (jnp.sum(h * wpm_ref[...], axis=-1, keepdims=True)
             + jnp.sum(gmf_vec * wpg_ref[...], axis=-1, keepdims=True)
             + bp_ref[0])                            # (tb, 1) f32

    # Lane-dense store: broadcast the logit column across 128 lanes; the wrapper
    # slices column 0.  Keeps the store path on full, unmasked vector stores.
    out_ref[...] = jnp.broadcast_to(jax.nn.sigmoid(logit), out_ref.shape).astype(out_ref.dtype)


# ----------------------------- Wrapper ----------------------------------------
def neumf_forward(users, items, params, *, block_batch=128, out_lanes=128):
    """NeuMF forward. users/items: int (B,). Returns float32 (B,) of probabilities."""
    B = users.shape[0]
    tb = block_batch
    B_pad = int(pl.cdiv(B, tb)) * tb

    users_pad = jnp.zeros((B_pad,), jnp.int32).at[:B].set(users.astype(jnp.int32))
    items_pad = jnp.zeros((B_pad,), jnp.int32).at[:B].set(items.astype(jnp.int32))

    # One combined table per id type: [GMF | MLP] columns -> one row DMA per id.
    user_tab = jnp.concatenate([params["gmf_user"], params["mlp_user"]], axis=1).astype(jnp.float32)
    item_tab = jnp.concatenate([params["gmf_item"], params["mlp_item"]], axis=1).astype(jnp.float32)

    F = params["gmf_user"].shape[1]
    Fm = params["mlp_user"].shape[1]
    h1 = params["w1u"].shape[1]
    h2 = params["w2"].shape[1]
    W = F + Fm

    w1u = params["w1u"].astype(jnp.bfloat16)
    w1i = params["w1i"].astype(jnp.bfloat16)
    w2 = params["w2"].astype(jnp.bfloat16)
    b1 = params["b1"].astype(jnp.float32)
    b2 = params["b2"].astype(jnp.float32)
    wpm = params["wp_mlp"].reshape(1, h2).astype(jnp.float32)   # (1, h2) row
    wpg = params["wp_gmf"].reshape(1, F).astype(jnp.float32)    # (1, F) row
    bp = params["bp"].reshape(1).astype(jnp.float32)            # scalar -> SMEM

    def const_map(b, u_ids, i_ids):     # weights: resident, DMA'd once
        return (0, 0)

    grid_spec = pltpu.PrefetchScalarGridSpec(
        num_scalar_prefetch=2,
        grid=(B_pad // tb,),
        in_specs=[
            pl.BlockSpec(memory_space=pl.ANY),                    # user table (HBM)
            pl.BlockSpec(memory_space=pl.ANY),                    # item table (HBM)
            pl.BlockSpec((Fm, h1), const_map),                    # w1u
            pl.BlockSpec((Fm, h1), const_map),                    # w1i
            pl.BlockSpec((1, h1), const_map),                     # b1
            pl.BlockSpec((h1, h2), const_map),                    # w2
            pl.BlockSpec((1, h2), const_map),                     # b2
            pl.BlockSpec((1, h2), const_map),                     # wp (MLP half) row
            pl.BlockSpec((1, F), const_map),                      # wp (GMF half) row
            pl.BlockSpec(memory_space=pltpu.MemorySpace.SMEM),    # bp scalar
        ],
        out_specs=pl.BlockSpec((tb, out_lanes), lambda b, u_ids, i_ids: (b, 0)),
        scratch_shapes=[
            pltpu.VMEM((tb, W), jnp.float32),        # gathered user rows
            pltpu.VMEM((tb, W), jnp.float32),        # gathered item rows
            pltpu.SemaphoreType.DMA((2,)),           # one DMA sem per table
        ],
    )

    out = pl.pallas_call(
        neumf_kernel,
        out_shape=jax.ShapeDtypeStruct((B_pad, out_lanes), jnp.float32),
        grid_spec=grid_spec,
        compiler_params=pltpu.CompilerParams(
            dimension_semantics=("parallel",),
            vmem_limit_bytes=32 * 1024 * 1024),
    )(users_pad, items_pad, user_tab, item_tab,
      w1u, w1i, b1, w2, b2, wpm, wpg, bp)

    return out[:B, 0]                                # matches torch .view(-1)


# ----------------------------- Pure-JAX reference ------------------------------
def neumf_reference(users, items, params):
    f32 = jnp.float32
    gmf_vec = params["gmf_user"][users] * params["gmf_item"][items]

    x = jnp.concatenate([params["mlp_user"][users], params["mlp_item"][items]], axis=-1)
    w1 = jnp.concatenate([params["w1u"], params["w1i"]], axis=0).astype(f32)
    x = jax.nn.relu(x @ w1 + params["b1"])
    x = jax.nn.relu(x @ params["w2"].astype(f32) + params["b2"])

    feat = jnp.concatenate([x, gmf_vec], axis=-1)    # [MLP, GMF] — same order as torch
    wp = jnp.concatenate([params["wp_mlp"], params["wp_gmf"]], axis=0)
    logit = feat @ wp + params["bp"]
    return jax.nn.sigmoid(logit).reshape(-1)


# ----------------------------- Parameter init ----------------------------------
def init_params(key, n_users, n_items, n_factors, n_layers):
    assert n_layers == 2, "script fixes n_layers=2 (kernel arg list is static)"
    Fm = n_factors * (2 ** (n_layers - 1))           # MLP embedding dim (=16)
    h1 = Fm                                          # first MLP hidden (=16)
    h2 = n_factors                                   # second MLP hidden (=8)

    ks = jax.random.split(key, 12)
    # Larger-than-torch init std so that every branch (GMF, MLP, biases)
    # contributes measurably to the output and the numerics check is meaningful.
    s_emb, s_w, s_b = 0.3, 0.3, 0.1
    f32, bf16 = jnp.float32, jnp.bfloat16
    return {
        "gmf_user": (s_emb * jax.random.normal(ks[0], (n_users, n_factors))).astype(f32),
        "gmf_item": (s_emb * jax.random.normal(ks[1], (n_items, n_factors))).astype(f32),
        "mlp_user": (s_emb * jax.random.normal(ks[2], (n_users, Fm))).astype(f32),
        "mlp_item": (s_emb * jax.random.normal(ks[3], (n_items, Fm))).astype(f32),
        # W1: (2*Fm, h1) split into the rows applied to the user / item halves
        "w1u": (s_w * jax.random.normal(ks[4], (Fm, h1))).astype(bf16),
        "w1i": (s_w * jax.random.normal(ks[5], (Fm, h1))).astype(bf16),
        "b1": (s_b * jax.random.normal(ks[6], (1, h1))).astype(f32),
        "w2": (s_w * jax.random.normal(ks[7], (h1, h2))).astype(bf16),
        "b2": (s_b * jax.random.normal(ks[8], (1, h2))).astype(f32),
        # pred layer: (2*n_factors, 1) split into MLP / GMF halves
        "wp_mlp": (s_w * jax.random.normal(ks[9], (h2, 1))).astype(f32),
        "wp_gmf": (s_w * jax.random.normal(ks[10], (n_factors, 1))).astype(f32),
        "bp": (s_b * jax.random.normal(ks[11], (1, 1))).astype(f32),
    }


# ----------------------------------- Main ---------------------------------------
if __name__ == "__main__":
    n_users, n_items, n_factors, n_layers = 300, 500, 8, 2
    batch = 200                                      # not a multiple of the 128-row tile

    key = jax.random.PRNGKey(0)
    k_param, k_u, k_i = jax.random.split(key, 3)

    params = init_params(k_param, n_users, n_items, n_factors, n_layers)
    users = jax.random.randint(k_u, (batch,), 0, n_users, dtype=jnp.int32)
    items = jax.random.randint(k_i, (batch,), 0, n_items, dtype=jnp.int32)

    out = neumf_forward(users, items, params)
    out = jax.block_until_ready(out)

    ref = neumf_reference(users, items, params)
    assert out.shape == (batch,)
    # kernel does the MLP matmuls in bf16 (f32 accumulate); reference is full f32
    # on the same (bf16-valued) weights -> ~1e-4 level differences expected.
    assert jnp.allclose(out, ref, atol=2e-3), (out, ref)

    print("KERNEL_OK")
</pallas_src>

<mosaic_0001>
module attributes {stable_mosaic.version = 11 : i64} {
  func.func @neumf_kernel(%arg0: i32, %arg1: memref<256xi32, #tpu.memory_space<smem>>, %arg2: memref<256xi32, #tpu.memory_space<smem>>, %arg3: memref<300x24xf32, #tpu.memory_space<any>>, %arg4: memref<500x24xf32, #tpu.memory_space<any>>, %arg5: memref<16x16xbf16, #tpu.memory_space<vmem>>, %arg6: memref<16x16xbf16, #tpu.memory_space<vmem>>, %arg7: memref<1x16xf32, #tpu.memory_space<vmem>>, %arg8: memref<16x8xbf16, #tpu.memory_space<vmem>>, %arg9: memref<1x8xf32, #tpu.memory_space<vmem>>, %arg10: memref<1x8xf32, #tpu.memory_space<vmem>>, %arg11: memref<1x8xf32, #tpu.memory_space<vmem>>, %arg12: memref<1xf32, #tpu.memory_space<smem>>, %arg13: memref<128x128xf32, #tpu.memory_space<vmem>>, %arg14: memref<128x24xf32, #tpu.memory_space<vmem>>, %arg15: memref<128x24xf32, #tpu.memory_space<vmem>>, %arg16: memref<2x!tpu.dma_semaphore, #tpu.memory_space<semaphore_mem>>) attributes {dimension_semantics = [#tpu.dimension_semantics<parallel>], iteration_bounds = array<i64: 2>, scalar_prefetch = 2 : i64, scratch_operands = 3 : i64, tpu.core_type = #tpu.core_type<tc>, window_params = [{}, {}, {pipeline_mode = #tpu.pipeline_mode<synchronous>, transform_indices = @transform_2, window_bounds = array<i64: 16, 16>}, {pipeline_mode = #tpu.pipeline_mode<synchronous>, transform_indices = @transform_3, window_bounds = array<i64: 16, 16>}, {pipeline_mode = #tpu.pipeline_mode<synchronous>, transform_indices = @transform_4, window_bounds = array<i64: 1, 16>}, {pipeline_mode = #tpu.pipeline_mode<synchronous>, transform_indices = @transform_5, window_bounds = array<i64: 16, 8>}, {pipeline_mode = #tpu.pipeline_mode<synchronous>, transform_indices = @transform_6, window_bounds = array<i64: 1, 8>}, {pipeline_mode = #tpu.pipeline_mode<synchronous>, transform_indices = @transform_7, window_bounds = array<i64: 1, 8>}, {pipeline_mode = #tpu.pipeline_mode<synchronous>, transform_indices = @transform_8, window_bounds = array<i64: 1, 8>}, {transform_indices = @transform_9, window_bounds = array<i64: 1>}, {transform_indices = @transform_10, window_bounds = array<i64: 128, 128>}]} {
    %c128_i32 = arith.constant 128 : i32
    %0 = arith.muli %arg0, %c128_i32 : i32
    %c0_i32 = arith.constant 0 : i32
    %c128_i32_0 = arith.constant 128 : i32
    %1 = arith.addi %c0_i32, %c128_i32_0 : i32
    %c1_i32 = arith.constant 1 : i32
    scf.for %arg17 = %c0_i32 to %1 step %c1_i32  : i32 {
      %c1_i32_32 = arith.constant 1 : i32
      %52 = arith.muli %arg17, %c1_i32_32 : i32
      %c0_i32_33 = arith.constant 0 : i32
      %53 = arith.addi %c0_i32_33, %52 : i32
      %54 = arith.addi %0, %53 : i32
      %55 = arith.index_cast %54 : i32 to index
      %56 = memref.load %arg1[%55] : memref<256xi32, #tpu.memory_space<smem>>
      %57 = arith.addi %0, %53 : i32
      %58 = arith.index_cast %57 : i32 to index
      %59 = memref.load %arg2[%58] : memref<256xi32, #tpu.memory_space<smem>>
      %c0_i32_34 = arith.constant 0 : i32
      %c0_i32_35 = arith.constant 0 : i32
      %60 = tpu.memref_slice %arg3[%56, %c0_i32_35] : memref<300x24xf32, #tpu.memory_space<any>> -> memref<1x24xf32, #tpu.memory_space<any>>
      %c0_i32_36 = arith.constant 0 : i32
      %61 = tpu.memref_slice %arg14[%53, %c0_i32_36] : memref<128x24xf32, #tpu.memory_space<vmem>> -> memref<1x24xf32, #tpu.memory_space<vmem>>
      %62 = tpu.memref_slice %arg16[%c0_i32_34] : memref<2x!tpu.dma_semaphore, #tpu.memory_space<semaphore_mem>> -> memref<1x!tpu.dma_semaphore, #tpu.memory_space<semaphore_mem>>
      %63 = tpu.memref_squeeze %62 : memref<1x!tpu.dma_semaphore, #tpu.memory_space<semaphore_mem>> -> memref<!tpu.dma_semaphore, #tpu.memory_space<semaphore_mem>>
      tpu.enqueue_dma source(%60 : memref<1x24xf32, #tpu.memory_space<any>>) target(%61 : memref<1x24xf32, #tpu.memory_space<vmem>>) target_semaphore(%63 : memref<!tpu.dma_semaphore, #tpu.memory_space<semaphore_mem>>)
      %c1_i32_37 = arith.constant 1 : i32
      %c0_i32_38 = arith.constant 0 : i32
      %64 = tpu.memref_slice %arg4[%59, %c0_i32_38] : memref<500x24xf32, #tpu.memory_space<any>> -> memref<1x24xf32, #tpu.memory_space<any>>
      %c0_i32_39 = arith.constant 0 : i32
      %65 = tpu.memref_slice %arg15[%53, %c0_i32_39] : memref<128x24xf32, #tpu.memory_space<vmem>> -> memref<1x24xf32, #tpu.memory_space<vmem>>
      %66 = tpu.memref_slice %arg16[%c1_i32_37] : memref<2x!tpu.dma_semaphore, #tpu.memory_space<semaphore_mem>> -> memref<1x!tpu.dma_semaphore, #tpu.memory_space<semaphore_mem>>
      %67 = tpu.memref_squeeze %66 : memref<1x!tpu.dma_semaphore, #tpu.memory_space<semaphore_mem>> -> memref<!tpu.dma_semaphore, #tpu.memory_space<semaphore_mem>>
      tpu.enqueue_dma source(%64 : memref<1x24xf32, #tpu.memory_space<any>>) target(%65 : memref<1x24xf32, #tpu.memory_space<vmem>>) target_semaphore(%67 : memref<!tpu.dma_semaphore, #tpu.memory_space<semaphore_mem>>)
    }
    %c128_i32_1 = arith.constant 128 : i32
    %c0_i32_2 = arith.constant 0 : i32
    %c128_i32_3 = arith.constant 128 : i32
    %2 = arith.addi %c0_i32_2, %c128_i32_3 : i32
    %c1_i32_4 = arith.constant 1 : i32
    scf.for %arg17 = %c0_i32_2 to %2 step %c1_i32_4  : i32 {
      %c0_i32_32 = arith.constant 0 : i32
      %c0_i32_33 = arith.constant 0 : i32
      %c0_i32_34 = arith.constant 0 : i32
      %52 = tpu.memref_slice %arg3[%c0_i32_33, %c0_i32_34] : memref<300x24xf32, #tpu.memory_space<any>> -> memref<1x24xf32, #tpu.memory_space<any>>
      %c0_i32_35 = arith.constant 0 : i32
      %c0_i32_36 = arith.constant 0 : i32
      %53 = tpu.memref_slice %arg14[%c0_i32_35, %c0_i32_36] : memref<128x24xf32, #tpu.memory_space<vmem>> -> memref<1x24xf32, #tpu.memory_space<vmem>>
      %54 = tpu.memref_slice %arg16[%c0_i32_32] : memref<2x!tpu.dma_semaphore, #tpu.memory_space<semaphore_mem>> -> memref<1x!tpu.dma_semaphore, #tpu.memory_space<semaphore_mem>>
      %55 = tpu.memref_squeeze %54 : memref<1x!tpu.dma_semaphore, #tpu.memory_space<semaphore_mem>> -> memref<!tpu.dma_semaphore, #tpu.memory_space<semaphore_mem>>
      tpu.wait_dma2 semaphore(%55 : memref<!tpu.dma_semaphore, #tpu.memory_space<semaphore_mem>>) src(%52 : memref<1x24xf32, #tpu.memory_space<any>>) dst(%53 : memref<1x24xf32, #tpu.memory_space<vmem>>)
      %c1_i32_37 = arith.constant 1 : i32
      %c0_i32_38 = arith.constant 0 : i32
      %c0_i32_39 = arith.constant 0 : i32
      %56 = tpu.memref_slice %arg4[%c0_i32_38, %c0_i32_39] : memref<500x24xf32, #tpu.memory_space<any>> -> memref<1x24xf32, #tpu.memory_space<any>>
      %c0_i32_40 = arith.constant 0 : i32
      %c0_i32_41 = arith.constant 0 : i32
      %57 = tpu.memref_slice %arg15[%c0_i32_40, %c0_i32_41] : memref<128x24xf32, #tpu.memory_space<vmem>> -> memref<1x24xf32, #tpu.memory_space<vmem>>
      %58 = tpu.memref_slice %arg16[%c1_i32_37] : memref<2x!tpu.dma_semaphore, #tpu.memory_space<semaphore_mem>> -> memref<1x!tpu.dma_semaphore, #tpu.memory_space<semaphore_mem>>
      %59 = tpu.memref_squeeze %58 : memref<1x!tpu.dma_semaphore, #tpu.memory_space<semaphore_mem>> -> memref<!tpu.dma_semaphore, #tpu.memory_space<semaphore_mem>>
      tpu.wait_dma2 semaphore(%59 : memref<!tpu.dma_semaphore, #tpu.memory_space<semaphore_mem>>) src(%56 : memref<1x24xf32, #tpu.memory_space<any>>) dst(%57 : memref<1x24xf32, #tpu.memory_space<vmem>>)
    }
    %c0 = arith.constant 0 : index
    %c0_5 = arith.constant 0 : index
    %3 = vector.load %arg14[%c0, %c0_5] : memref<128x24xf32, #tpu.memory_space<vmem>>, vector<128x24xf32>
    %c0_6 = arith.constant 0 : index
    %c0_7 = arith.constant 0 : index
    %4 = vector.load %arg15[%c0_6, %c0_7] : memref<128x24xf32, #tpu.memory_space<vmem>>, vector<128x24xf32>
    %5 = vector.extract_strided_slice %3 {offsets = [0, 0], sizes = [128, 8], strides = [1, 1]} : vector<128x24xf32> to vector<128x8xf32>
    %6 = vector.extract_strided_slice %4 {offsets = [0, 0], sizes = [128, 8], strides = [1, 1]} : vector<128x24xf32> to vector<128x8xf32>
    %7 = arith.mulf %5, %6 : vector<128x8xf32>
    %8 = vector.extract_strided_slice %3 {offsets = [0, 8], sizes = [128, 16], strides = [1, 1]} : vector<128x24xf32> to vector<128x16xf32>
    %9 = arith.truncf %8 : vector<128x16xf32> to vector<128x16xbf16>
    %10 = vector.extract_strided_slice %4 {offsets = [0, 8], sizes = [128, 16], strides = [1, 1]} : vector<128x24xf32> to vector<128x16xf32>
    %11 = arith.truncf %10 : vector<128x16xf32> to vector<128x16xbf16>
    %c0_8 = arith.constant 0 : index
    %c0_9 = arith.constant 0 : index
    %12 = vector.load %arg5[%c0_8, %c0_9] : memref<16x16xbf16, #tpu.memory_space<vmem>>, vector<16x16xbf16>
    %cst = arith.constant dense<0.000000e+00> : vector<128x16xf32>
    %13 = tpu.matmul %9, %12, %cst {dimension_numbers = #tpu.dot_dimension_numbers<[1], [0], [0], [1], [0, 0, 1, 1], [], []>} : vector<128x16xbf16>, vector<16x16xbf16>, vector<128x16xf32> -> vector<128x16xf32>
    %c0_10 = arith.constant 0 : index
    %c0_11 = arith.constant 0 : index
    %14 = vector.load %arg6[%c0_10, %c0_11] : memref<16x16xbf16, #tpu.memory_space<vmem>>, vector<16x16xbf16>
    %cst_12 = arith.constant dense<0.000000e+00> : vector<128x16xf32>
    %15 = tpu.matmul %11, %14, %cst_12 {dimension_numbers = #tpu.dot_dimension_numbers<[1], [0], [0], [1], [0, 0, 1, 1], [], []>} : vector<128x16xbf16>, vector<16x16xbf16>, vector<128x16xf32> -> vector<128x16xf32>
    %16 = arith.addf %13, %15 : vector<128x16xf32>
    %c0_13 = arith.constant 0 : index
    %c0_14 = arith.constant 0 : index
    %17 = vector.load %arg7[%c0_13, %c0_14] : memref<1x16xf32, #tpu.memory_space<vmem>>, vector<1x16xf32>
    %18 = vector.broadcast %17 : vector<1x16xf32> to vector<128x16xf32>
    %19 = arith.addf %16, %18 : vector<128x16xf32>
    %cst_15 = arith.constant 0.000000e+00 : f32
    %20 = vector.broadcast %cst_15 : f32 to vector<128x16xf32>
    %21 = arith.maximumf %19, %20 : vector<128x16xf32>
    %22 = arith.truncf %21 : vector<128x16xf32> to vector<128x16xbf16>
    %c0_16 = arith.constant 0 : index
    %c0_17 = arith.constant 0 : index
    %23 = vector.load %arg8[%c0_16, %c0_17] : memref<16x8xbf16, #tpu.memory_space<vmem>>, vector<16x8xbf16>
    %cst_18 = arith.constant dense<0.000000e+00> : vector<128x8xf32>
    %24 = tpu.matmul %22, %23, %cst_18 {dimension_numbers = #tpu.dot_dimension_numbers<[1], [0], [0], [1], [0, 0, 1, 1], [], []>} : vector<128x16xbf16>, vector<16x8xbf16>, vector<128x8xf32> -> vector<128x8xf32>
    %c0_19 = arith.constant 0 : index
    %c0_20 = arith.constant 0 : index
    %25 = vector.load %arg9[%c0_19, %c0_20] : memref<1x8xf32, #tpu.memory_space<vmem>>, vector<1x8xf32>
    %26 = vector.broadcast %25 : vector<1x8xf32> to vector<128x8xf32>
    %27 = arith.addf %24, %26 : vector<128x8xf32>
    %cst_21 = arith.constant 0.000000e+00 : f32
    %28 = vector.broadcast %cst_21 : f32 to vector<128x8xf32>
    %29 = arith.maximumf %27, %28 : vector<128x8xf32>
    %c0_22 = arith.constant 0 : index
    %c0_23 = arith.constant 0 : index
    %30 = vector.load %arg10[%c0_22, %c0_23] : memref<1x8xf32, #tpu.memory_space<vmem>>, vector<1x8xf32>
    %31 = vector.broadcast %30 : vector<1x8xf32> to vector<128x8xf32>
    %32 = arith.mulf %29, %31 : vector<128x8xf32>
    %cst_24 = arith.constant dense<0.000000e+00> : vector<128xf32>
    %33 = vector.multi_reduction <add>, %32, %cst_24 [1] : vector<128x8xf32> to vector<128xf32>
    %34 = vector.shape_cast %33 : vector<128xf32> to vector<128x1xf32>
    %c0_25 = arith.constant 0 : index
    %c0_26 = arith.constant 0 : index
    %35 = vector.load %arg11[%c0_25, %c0_26] : memref<1x8xf32, #tpu.memory_space<vmem>>, vector<1x8xf32>
    %36 = vector.broadcast %35 : vector<1x8xf32> to vector<128x8xf32>
    %37 = arith.mulf %7, %36 : vector<128x8xf32>
    %cst_27 = arith.constant dense<0.000000e+00> : vector<128xf32>
    %38 = vector.multi_reduction <add>, %37, %cst_27 [1] : vector<128x8xf32> to vector<128xf32>
    %39 = vector.shape_cast %38 : vector<128xf32> to vector<128x1xf32>
    %40 = arith.addf %34, %39 : vector<128x1xf32>
    %c0_28 = arith.constant 0 : index
    %41 = memref.load %arg12[%c0_28] : memref<1xf32, #tpu.memory_space<smem>>
    %42 = vector.broadcast %41 : f32 to vector<128x1xf32>
    %43 = arith.addf %40, %42 : vector<128x1xf32>
    %44 = arith.negf %43 : vector<128x1xf32>
    %45 = math.exp %44 : vector<128x1xf32>
    %cst_29 = arith.constant 1.000000e+00 : f32
    %46 = vector.broadcast %cst_29 : f32 to vector<128x1xf32>
    %47 = arith.addf %46, %45 : vector<128x1xf32>
    %48 = arith.divf %46, %47 : vector<128x1xf32>
    %49 = vector.shape_cast %48 : vector<128x1xf32> to vector<128x1xf32>
    %50 = vector.broadcast %49 : vector<128x1xf32> to vector<128x128xf32>
    %c0_30 = arith.constant 0 : index
    %c0_31 = arith.constant 0 : index
    %51 = vector.load %arg13[%c0_30, %c0_31] : memref<128x128xf32, #tpu.memory_space<vmem>>, vector<128x128xf32>
    tpu.vector_store %arg13[%c0_30, %c0_31], %50 {strides = array<i32>} : memref<128x128xf32, #tpu.memory_space<vmem>>, vector<128x128xf32>,
    return
  }
  func.func @transform_2(%arg0: i32, %arg1: memref<256xi32, #tpu.memory_space<smem>>, %arg2: memref<256xi32, #tpu.memory_space<smem>>) -> (i32, i32) {
    %c0_i32 = arith.constant 0 : i32
    %c0_i32_0 = arith.constant 0 : i32
    %c0_i32_1 = arith.constant 0 : i32
    return %c0_i32, %c0_i32_0 : i32, i32
  }
  func.func @transform_3(%arg0: i32, %arg1: memref<256xi32, #tpu.memory_space<smem>>, %arg2: memref<256xi32, #tpu.memory_space<smem>>) -> (i32, i32) {
    %c0_i32 = arith.constant 0 : i32
    %c0_i32_0 = arith.constant 0 : i32
    %c0_i32_1 = arith.constant 0 : i32
    return %c0_i32, %c0_i32_0 : i32, i32
  }
  func.func @transform_4(%arg0: i32, %arg1: memref<256xi32, #tpu.memory_space<smem>>, %arg2: memref<256xi32, #tpu.memory_space<smem>>) -> (i32, i32) {
    %c0_i32 = arith.constant 0 : i32
    %c0_i32_0 = arith.constant 0 : i32
    %c0_i32_1 = arith.constant 0 : i32
    return %c0_i32, %c0_i32_0 : i32, i32
  }
  func.func @transform_5(%arg0: i32, %arg1: memref<256xi32, #tpu.memory_space<smem>>, %arg2: memref<256xi32, #tpu.memory_space<smem>>) -> (i32, i32) {
    %c0_i32 = arith.constant 0 : i32
    %c0_i32_0 = arith.constant 0 : i32
    %c0_i32_1 = arith.constant 0 : i32
    return %c0_i32, %c0_i32_0 : i32, i32
  }
  func.func @transform_6(%arg0: i32, %arg1: memref<256xi32, #tpu.memory_space<smem>>, %arg2: memref<256xi32, #tpu.memory_space<smem>>) -> (i32, i32) {
    %c0_i32 = arith.constant 0 : i32
    %c0_i32_0 = arith.constant 0 : i32
    %c0_i32_1 = arith.constant 0 : i32
    return %c0_i32, %c0_i32_0 : i32, i32
  }
  func.func @transform_7(%arg0: i32, %arg1: memref<256xi32, #tpu.memory_space<smem>>, %arg2: memref<256xi32, #tpu.memory_space<smem>>) -> (i32, i32) {
    %c0_i32 = arith.constant 0 : i32
    %c0_i32_0 = arith.constant 0 : i32
    %c0_i32_1 = arith.constant 0 : i32
    return %c0_i32, %c0_i32_0 : i32, i32
  }
  func.func @transform_8(%arg0: i32, %arg1: memref<256xi32, #tpu.memory_space<smem>>, %arg2: memref<256xi32, #tpu.memory_space<smem>>) -> (i32, i32) {
    %c0_i32 = arith.constant 0 : i32
    %c0_i32_0 = arith.constant 0 : i32
    %c0_i32_1 = arith.constant 0 : i32
    return %c0_i32, %c0_i32_0 : i32, i32
  }
  func.func @transform_9(%arg0: i32, %arg1: memref<256xi32, #tpu.memory_space<smem>>, %arg2: memref<256xi32, #tpu.memory_space<smem>>) -> i32 {
    %c0_i32 = arith.constant 0 : i32
    %c0_i32_0 = arith.constant 0 : i32
    return %c0_i32 : i32
  }
  func.func @transform_10(%arg0: i32, %arg1: memref<256xi32, #tpu.memory_space<smem>>, %arg2: memref<256xi32, #tpu.memory_space<smem>>) -> (i32, i32) {
    %c0_i32 = arith.constant 0 : i32
    %c0_i32_0 = arith.constant 0 : i32
    return %arg0, %c0_i32 : i32, i32
  }
}

</mosaic_0001>

<bundles_post_ra>
// kernel: tpu_custom_call.1
= control target key start
LH: loop header
LB: loop body
LE: loop exit
PB: predicated region body
PF: predicated region fallthrough
CT: control target
= control target key end

     0   :  { %s1720_s27 = smov [#allocation6]   ;;  %s1721_s28 = smov [#allocation7]   ;;  %s2243_s0 = inlined_call_operand.vmem [shape: s32[256], index: 0, kind: input, shape index: {}]   ;;  %s2244_s2 = inlined_call_operand.vmem [shape: f32[300,24], index: 2, kind: input, shape index: {}]   ;;  %s2245_s3 = inlined_call_operand.vmem [shape: f32[500,24], index: 3, kind: input, shape index: {}]   ;;  %s2246_s4 = inlined_call_operand.vmem [shape: bf16[16,16], index: 4, kind: input, shape index: {}]   ;;  %s2247_s5 = inlined_call_operand.vmem [shape: bf16[16,16], index: 5, kind: input, shape index: {}]   ;;  %s2248_s6 = inlined_call_operand.vmem [shape: f32[1,16], index: 6, kind: input, shape index: {}]   ;;  %s2249_s7 = inlined_call_operand.vmem [shape: bf16[16,8], index: 7, kind: input, shape index: {}]   ;;  %s2250_s8 = inlined_call_operand.vmem [shape: f32[1,8], index: 8, kind: input, shape index: {}]   ;;  %s2251_s9 = inlined_call_operand.vmem [shape: f32[1,8], index: 9, kind: input, shape index: {}]   ;;  %s2252_s10 = inlined_call_operand.vmem [shape: f32[1,8], index: 10, kind: input, shape index: {}]   ;;  %s2253_s12 = inlined_call_operand.hbm [shape: f32[256,128], index: 12, kind: output, shape index: {}]   ;;  %s2254_s1 = inlined_call_operand.vmem [shape: s32[256], index: 1, kind: input, shape index: {}]   ;;  %s2255_s11 = inlined_call_operand.<no memory space> [shape: f32[1], index: 11, kind: input, shape index: {}]  }
   0x1   :  { %s18_s23 = sshll.u32 %s2243_s0, 4  ;;  %s23_s26 = sshll.u32 %s2254_s1, 4  ;;  %s19_s23 = int_to_ptr.vmem [resolvable:$true] %s18_s23  ;;  %s24_s26 = int_to_ptr.vmem [resolvable:$true] %s23_s26 }
   0x2   :  { %21 = dma.vmem_to_smem %s19_s23, 32, %s1720_s27, [#allocation5] }
   0x3   :  { %26 = dma.vmem_to_smem %s24_s26, 32, %s1721_s28, [#allocation5] }
   0x4   :  { %27 = sst [smem:[#allocation8]] %s2255_s11 }
   0x5   :  { %1686 = dma.done.wait [#allocation5], 64 }
   0x6   :  { %1687 = vsyncadd [#allocation5], 4294967232 }
   0x7   :  { %30 = sfence }
   0x8   :  { %31 = vsyncpa [#allocation10], 0 }
   0x9   :  { %33 = vsyncpa [#allocation10 + $0x1], 0  ;;  %s1799_s0 = smov 0   ;;  %s1801_s13 = smov 0  }
   0xa   :  { %s1803_s1 = smov 0   ;;  %s1805_s14 = smov 0  }
   0xb LB: > { %s1410_s11 = sadd.s32 4294967295, %s1710_s14   ;;  %s1411_s15 = sadd.s32 4294967294, %s1710_s14   ;;  %s1710_s14 = sphi %s1805_s14, %s2265_s14   ;;  %s1706_s1 = sphi %s1803_s1, %s2264_s1   ;;  %s1702_s13 = sphi %s1801_s13, %s2263_s13   ;;  %s1698_s0 = sphi %s1799_s0, %s2262_s0  }
   0xc   : > { %s1822_s16 = sadd.s32 1, %s1710_s14   ;;  %s214_s17 = sadd.s32 1, %s1706_s1 }
   0xd   : > { %s211_s18 = ssub.s32 %s1710_s14, %s1822_s16  ;;  %p224_p0 = scmp.ne.s32.totalorder %s1706_s1, %s1702_s13 }
   0xe   : > { %p212_p1 = scmp.eq.s32.totalorder %s211_s18, 0  ;;  %p225_p2 = scmp.eq.s32.totalorder %s1410_s11, 1 }
   0xf   : > { %p230_p3 = scmp.ne.s32.totalorder %s1702_s13, %s1698_s0  ;;  %p231_p4 = scmp.eq.s32.totalorder %s1411_s15, 1 }
  0x10   : > { %s1832_s19 = scalar_select %p212_p1, %s1706_s1, %s214_s17  }
  0x11   : > { %p1834_p5 = por %p225_p2, %p224_p0  ;;  %p1838_p6 = por %p231_p4, %p230_p3 }
  0x12   : > { %2257 = sst [smem:[#allocation17_spill]] %s1832_s19  ;;  %p1413_p7 = scmp.ge.s32.totalorder %s1710_s14, 1 }
  0x13   : > { %p273_p8 = scmp.lt.s32.totalorder %s1710_s14, 3 }
  0x15   : > { %p274_p9 = pnand %p1413_p7, %p273_p8 }
  0x16   : > { %s2256_s22 = sand.u32 (!%p274_p9), 1, %s1702_s13   ;;  %s1845_s23 = sshll.u32 (!%p274_p9), %s1410_s11, 7 }
  0x17   : > { %277 = sbr.rel (%p274_p9) target bundleno = 712 (0x2c8), region = 52  ;;  %s1414_s24 = sshll.u32 (!%p274_p9), %s2256_s22, 7 }
  0x18   : > { %s1849_s25 = scalar_lea.vmem (!%p274_p9), [#allocation9], %s1414_s24  ;;  %s1712_s26 = smov (!%p274_p9), 0  }
  0x1c LB: >> { %s311_s27 = sadd.s32 %s1714_s26, %s1845_s23  ;;  %s315_s18 = scalar_lea.vmem [#allocation2], %s1714_s26  ;;  %s1714_s26 = sphi %s1712_s26, %s310_s26  }
  0x1d   : >> { %s312_s28 = sld [smem:[#allocation6 + %s311_s27]] }
  0x1e   : >> { %s313_s29 = sld [smem:[#allocation7 + %s311_s27]] }
  0x23   : >> { %s314_s17 = scalar_lea.vmem %s2244_s2, %s312_s28 }
  0x24   : >> { %v330_v0 = vld [vmem:[%s314_s17] sm:$0x1] }
  0x25   : >> { %331 = vst [vmem:[%s315_s18] sm:$0x1] %v330_v0 }
  0x26   : >> { %349 = vsyncadd [#allocation4], 16  ;;  %s350_s24 = scalar_lea.vmem %s2245_s3, %s313_s29  ;;  %s351_s19 = scalar_lea.vmem [#allocation3], %s1714_s26 }
  0x27   : >> { %v367_v1 = vld [vmem:[%s350_s24] sm:$0x1] }
  0x28   : >> { %368 = vst [vmem:[%s351_s19] sm:$0x1] %v367_v1 }
  0x29   : >> { %386 = vsyncadd [#allocation4 + $0x1], 16  ;;  %s310_s26 = sadd.s32 1, %s1714_s26  }
  0x2a   : >> { %p307_p10 = scmp.ge.s32.totalorder %s310_s26, 128  }
  0x2b   : > { %s1716_s27 = smov (%p307_p10), 0  }
  0x2c   : > { %309 = sbr.rel (!%p307_p10) target bundleno = 28 (0x1c), region = 173 }
  0x31 LB: >> { %1688 = dma.done.wait [#allocation4], 16  ;;  %s1718_s27 = sphi %s1716_s27, %s392_s27  }
  0x32   : >> { %1689 = vsyncadd [#allocation4], 4294967280 }
  0x33   : >> { %1690 = dma.done.wait [#allocation4 + $0x1], 16 }
  0x34   : >> { %1691 = vsyncadd [#allocation4 + $0x1], 4294967280  ;;  %s392_s27 = sadd.s32 1, %s1718_s27  }
  0x35   : >> { %p389_p11 = scmp.ge.s32.totalorder %s392_s27, 128  }
  0x36   : > { %v417_v2 = vld [vmem:[#allocation3 + $0x10] sm:$0xff] (%p389_p11)  ;;  %v418_v3 = vld [vmem:[#allocation3 + $0x18] sm:$0xff] (%p389_p11)  ;;  %v415_v8 = vld [vmem:[#allocation3] sm:$0xff] (%p389_p11)  ;;  %s1722_s19 = smov (%p389_p11), 120   ;;  %vm497_vm0 = vcmask (%p389_p11), 130048   ;;  %vm839_vm1 = vcmask (%p389_p11), 64512   ;;  %s1322_s15 = scalar_lea.hbm (%p389_p11), %s2253_s12, %s1845_s23 }
  0x37   : > { %391 = sbr.rel (!%p389_p11) target bundleno = 49 (0x31), region = 184  ;;  %v401_v4 = vld [vmem:[#allocation2 + $0x10] sm:$0xff] (%p389_p11)  ;;  %v456_v5 = vpack.c.bf16 (%p389_p11), %v418_v3, %v417_v2  ;;  %v402_v6 = vld [vmem:[#allocation2 + $0x18] sm:$0xff] (%p389_p11)  ;;  %v416_v9 = vld [vmem:[#allocation3 + $0x8] sm:$0xff] (%p389_p11)  ;;  %s972_s28 = sld [smem:[#allocation8]] (%p389_p11) }
  0x38   : > { %v1858_v7 = vmul.f32 (%p389_p11), %v417_v2, %v401_v4  ;;  %v1860_v10 = vmul.f32 (%p389_p11), %v418_v3, %v402_v6  ;;  %v455_v11 = vpack.c.bf16 (%p389_p11), %v416_v9, %v415_v8  ;;  %v399_v12 = vld [vmem:[#allocation2] sm:$0xff] (%p389_p11)  ;;  %v400_v13 = vld [vmem:[#allocation2 + $0x8] sm:$0xff] (%p389_p11)  ;;  %v448_v23 = vpack.c.bf16 (%p389_p11), %v402_v6, %v401_v4  ;;  %v1881_v28 = vld [vmem:[#allocation3 + $0x70] sm:$0xff] (%p389_p11)  ;;  %s1323_s17 = sshll.u32 (%p389_p11), %s1849_s25, 4  ;;  %s2210_s18 = sshll.u32 (%p389_p11), %s1322_s15, 4  ;;  %s1324_s17 = int_to_ptr.vmem [resolvable:$true] %s1323_s17  ;;  %s1326_s18 = int_to_ptr.hbm [resolvable:$true] %s2210_s18 }
  0x39   : > { %477 = vrot.lane.b32.xlu1 (%p389_p11), %v456_v5, %s1722_s19  ;;  %v1863_v14 = vmul.f32 (%p389_p11), %v415_v8, %v399_v12  ;;  %v1865_v15 = vmul.f32 (%p389_p11), %v416_v9, %v400_v13  ;;  %v427_v16 = vld [vmem:[#allocation3 + $0x60] sm:$0xff] (%p389_p11)  ;;  %v428_v17 = vld [vmem:[#allocation3 + $0x68] sm:$0xff] (%p389_p11)  ;;  %v447_v26 = vpack.c.bf16 (%p389_p11), %v400_v13, %v399_v12  ;;  %v1883_v29 = vld [vmem:[#allocation3 + $0x78] sm:$0xff] (%p389_p11)  ;;  %s2260_s23 = sand.u32 (%p389_p11), 1, %s1702_s13   ;;  %s1648_s24 = sshra.s32 (%p389_p11), %s1326_s18, 4  ;;  %s1649_s24 = int_to_ptr.hbm [resolvable:$true] %s1648_s24 }
  0x3a   : > { %475 = vrot.lane.b32.xlu0 (%p389_p11), %v455_v11, %s1722_s19  ;;  %v461_v18 = vpack.c.bf16 (%p389_p11), %v428_v17, %v427_v16  ;;  %v411_v19 = vld [vmem:[#allocation2 + $0x60] sm:$0xff] (%p389_p11)  ;;  %v412_v20 = vld [vmem:[#allocation2 + $0x68] sm:$0xff] (%p389_p11)  ;;  %v462_v33 = vpack.c.bf16 (%p389_p11), %v1883_v29, %v1881_v28  ;;  %v1895_v34 = vld [vmem:[#allocation3 + $0x30] sm:$0xff] (%p389_p11)  ;;  %s1311_s11 = scalar_lea.sflag (%p389_p11), [#allocation10], %s2260_s23  ;;  %s1650_s27 = scalar_lea.hbm (%p389_p11), %s1649_s24, 128 }
  0x3b   : > { %v1868_v21 = vmul.f32 (%p389_p11), %v427_v16, %v411_v19  ;;  %v1870_v22 = vmul.f32 (%p389_p11), %v428_v17, %v412_v20  ;;  %v1873_v24 = vld [vmem:[#allocation3 + $0x20] sm:$0xff] (%p389_p11)  ;;  %v1875_v25 = vld [vmem:[#allocation3 + $0x28] sm:$0xff] (%p389_p11)  ;;  %v1897_v35 = vld [vmem:[#allocation3 + $0x38] sm:$0xff] (%p389_p11)  ;;  %v453_v40 = vpack.c.bf16 (%p389_p11), %v412_v20, %v411_v19  ;;  %p1651_p12 = scmp.ne.s32.totalorder (%p389_p11), %s1649_s24, %s1650_s27  ;;  %s1654_s26 = scalar_lea.hbm (%p389_p11), %s2253_s12, 256 }
  0x3c   : > { %487 = vrot.lane.b32.xlu2 %v461_v18, %s1722_s19  ;;  %v457_v27 = vpack.c.bf16 %v1875_v25, %v1873_v24  ;;  %v1476_v30 = vld [vmem:[%s2247_s5] sm:$0xff]  ;;  %v1890_v32 = vld [vmem:[#allocation2 + $0x28] sm:$0xff]  ;;  %v458_v37 = vpack.c.bf16 %v1897_v35, %v1895_v34  ;;  %v1905_v38 = vld [vmem:[#allocation2 + $0x30] sm:$0xff]  ;;  %p1655_p1 = scmp.lt.s32.totalorder %s1649_s24, %s2253_s12  ;;  %p1656_p2 = scmp.lt.s32.totalorder %s1654_s26, %s1650_s27 }
  0x3d   : > { %v1888_v31 = vld [vmem:[#allocation2 + $0x20] sm:$0xff]  ;;  %529 = vmatpush.bf16.msra.mxu0 %v1476_v30  ;;  %1479 = vmatpush.bf16.msra.mxu3 %v1476_v30  ;;  %v1907_v39 = vld [vmem:[#allocation2 + $0x38] sm:$0xff]  ;;  %v1912_v42 = vld [vmem:[#allocation3 + $0x48] sm:$0xff]  ;;  %p1652_p13 = pnand %p1651_p12, %p1834_p5 }
  0x3e   : > { %v449_v36 = vpack.c.bf16 %v1890_v32, %v1888_v31  ;;  %v1910_v41 = vld [vmem:[#allocation3 + $0x40] sm:$0xff]  ;;  %v450_v43 = vpack.c.bf16 %v1907_v39, %v1905_v38  ;;  %v1919_v45 = vld [vmem:[#allocation2 + $0x70] sm:$0xff]  ;;  %v1921_v46 = vld [vmem:[#allocation2 + $0x78] sm:$0xff]  ;;  %p1657_p3 = por %p1656_p2, %p1655_p1 }
  0x3f   : > { %v459_v44 = vpack.c.bf16 %v1912_v42, %v1910_v41  ;;  %v1924_v47 = vld [vmem:[#allocation2 + $0x40] sm:$0xff]  ;;  %v1926_v48 = vld [vmem:[#allocation2 + $0x48] sm:$0xff]  ;;  %v454_v49 = vpack.c.bf16 %v1921_v46, %v1919_v45  ;;  %v1931_v50 = vld [vmem:[#allocation3 + $0x50] sm:$0xff]  ;;  %p1653_p0 = pneg %p1652_p13 }
  0x40   : > { %v1933_v51 = vld [vmem:[#allocation3 + $0x58] sm:$0xff]  ;;  %v451_v52 = vpack.c.bf16 %v1926_v48, %v1924_v47  ;;  %v1941_v54 = vld [vmem:[#allocation2 + $0x50] sm:$0xff]  ;;  %v1475_v57 = vld [vmem:[%s2246_s4] sm:$0xff] }
  0x41   : > { %581 = vrot.lane.b32.xlu1 %v448_v23, %s1722_s19  ;;  %v460_v53 = vpack.c.bf16 %v1933_v51, %v1931_v50  ;;  %v1943_v55 = vld [vmem:[#allocation2 + $0x58] sm:$0xff]  ;;  %632 = vmatpush.bf16.msra.mxu1 %v1475_v57  ;;  %v1477_v12 = vld [vmem:[%s2249_s7] sm:$0xff]  ;;  %p1658_p4 = pnand %p1657_p3, %p1653_p0 }
  0x42   : > { %579 = vrot.lane.b32.xlu0 %v447_v26, %s1722_s19  ;;  %v452_v56 = vpack.c.bf16 %v1943_v55, %v1941_v54  ;;  %1480 = vmatpush.bf16.msrb.mxu3 %v1475_v57  ;;  %v1974_v23 = vld [vmem:[%s2248_s6] ss:$0 sm:$0xff] }
  0x43   : > { %761 = vmatpush.bf16.msra.mxu2 %v1477_v12 }
  0x44   : > { %479 = vrot.lane.b32.xlu2 %v457_v27, %s1722_s19 }
  0x49   : > { %489 = vrot.lane.b32.xlu1 %v462_v33, %s1722_s19 }
  0x4a   : > { %583 = vrot.lane.b32.xlu0 %v449_v36, %s1722_s19 }
  0x4c   : > { %481 = vrot.lane.b32.xlu2 %v458_v37, %s1722_s19 }
  0x51   : > { %591 = vrot.lane.b32.xlu1 %v453_v40, %s1722_s19 }
  0x52   : > { %585 = vrot.lane.b32.xlu0 %v450_v43, %s1722_s19 }
  0x54   : > { %483 = vrot.lane.b32.xlu2 %v459_v44, %s1722_s19 }
  0x59   : > { %593 = vrot.lane.b32.xlu1 %v454_v49, %s1722_s19 }
  0x5a   : > { %587 = vrot.lane.b32.xlu0 %v451_v52, %s1722_s19 }
  0x5c   : > { %485 = vrot.lane.b32.xlu2 %v460_v53, %s1722_s19 }
  0x62   : > { %589 = vrot.lane.b32.xlu0 %v452_v56, %s1722_s19 }
  0x96   : > { %v488_v58 = vpop.permute.xlu2 %487 }
  0x97   : > { %1426 = vmatmul.msk.bf16.vlgmr.msra.gmra.mxu3 %vm497_vm0, %v488_v58 }
  0x98   : > { %1481 = vmatpush.bf16.msra.mxu3 %v1477_v12 }
  0x9e   : > { %v480_v1 = vpop.permute.xlu2 %479 }
  0xa6   : > { %v482_v4 = vpop.permute.xlu2 %481 }
  0xab   : > { %v478_v59 = vpop.permute.xlu1 %477 }
  0xac   : > { %v476_v60 = vpop.permute.xlu0 %475 }
  0xad   : > { %1420 = vmatmul.msk.bf16.vlgmr.msra.gmra.mxu0 %vm497_vm0, %v476_v60 }
  0xae   : > { %v484_v6 = vpop.permute.xlu2 %483 }
  0xb3   : > { %v582_v61 = vpop.permute.xlu1 %581 }
  0xb4   : > { %v580_v62 = vpop.permute.xlu0 %579 }
  0xb5   : > { %1432 = vmatmul.msk.bf16.vlgmr.msra.gmra.mxu1 %vm497_vm0, %v580_v62 }
  0xb6   : > { %v486_v9 = vpop.permute.xlu2 %485 }
  0xbb   : > { %v490_v63 = vpop.permute.xlu1 %489 }
  0xbc   : > { %1427 = vmatmul.msk.bf16.gmra.mxu3 %vm497_vm0, %v490_v63  ;;  %v584_v2 = vpop.permute.xlu0 %583 }
  0xbd   : > { %1421 = vmatmul.msk.bf16.gmra.mxu0 %vm497_vm0, %v478_v59 }
  0xc3   : > { %v592_v0 = vpop.permute.xlu1 %591 }
  0xc4   : > { %v586_v5 = vpop.permute.xlu0 %585 }
  0xc5   : > { %1433 = vmatmul.msk.bf16.gmra.mxu1 %vm497_vm0, %v582_v61 }
  0xcb   : > { %v594_v3 = vpop.permute.xlu1 %593 }
  0xcc   : > { %1438 = vmatmul.msk.bf16.vlgmr.msrb.gmra.mxu3 %vm497_vm0, %v592_v0  ;;  %v588_v8 = vpop.permute.xlu0 %587 }
  0xcd   : > { %1422 = vmatmul.msk.bf16.gmra.mxu0 %vm497_vm0, %v480_v1 }
  0xd4   : > { %v590_v11 = vpop.permute.xlu0 %589 }
  0xd5   : > { %1434 = vmatmul.msk.bf16.gmra.mxu1 %vm497_vm0, %v584_v2 }
  0xdc   : > { %1439 = vmatmul.msk.bf16.gmra.mxu3 %vm497_vm0, %v594_v3 }
  0xdd   : > { %1423 = vmatmul.msk.bf16.gmra.mxu0 %vm497_vm0, %v482_v4 }
  0xe5   : > { %1435 = vmatmul.msk.bf16.gmra.mxu1 %vm497_vm0, %v586_v5 }
  0xed   : > { %1424 = vmatmul.msk.bf16.gmra.mxu0 %vm497_vm0, %v484_v6 }
  0xf5   : > { %1436 = vmatmul.msk.bf16.gmra.mxu1 %vm497_vm0, %v588_v8 }
  0xfd   : > { %1425 = vmatmul.msk.bf16.gmra.mxu0 %vm497_vm0, %v486_v9 }
 0x105   : > { %1437 = vmatmul.msk.bf16.gmra.mxu1 %vm497_vm0, %v590_v11 }
 0x11a   : > { %v561_v16 = vpop.f32.mrf.mxu3 }
 0x122   : > { %v563_v19 = vpop.f32.mrf.mxu3 }
 0x12a   : > { %v531_v13 = vpop.f32.mrf.mxu0 }
 0x132   : > { %v533_v17 = vpop.f32.mrf.mxu0  ;;  %v634_v18 = vpop.f32.mrf.mxu1 }
 0x133   : > { %v635_v20 = vadd.f32 %v634_v18, %v531_v13 }
 0x135   : > { %v678_v30 = vadd.f32 %v1974_v23, %v635_v20 }
 0x137   : > { %v694_v37 = vmax.f32 %v678_v30, 0.0 }
 0x13a   : > { %v536_v26 = vpop.f32.mrf.mxu0  ;;  %v636_v27 = vpop.f32.mrf.mxu1 }
 0x13b   : > { %v637_v33 = vadd.f32 %v636_v27, %v533_v17 }
 0x13d   : > { %v679_v36 = vadd.f32 %v1974_v23, %v637_v33 }
 0x13f   : > { %v695_v40 = vmax.f32 %v679_v36, 0.0  ;;  %v566_v43 = vpop.f32.mrf.mxu3 }
 0x141   : > { %v710_v44 = vpack.c.bf16 %v695_v40, %v694_v37 }
 0x142   : > { %v538_v49 = vpop.f32.mrf.mxu0  ;;  %v639_v52 = vpop.f32.mrf.mxu1 }
 0x143   : > { %1444 = vmatmul.msk.bf16.vlgmr.msra.gmra.mxu2 %vm497_vm0, %v710_v44  ;;  %v640_v53 = vadd.f32 %v639_v52, %v536_v26 }
 0x145   : > { %v680_v59 = vadd.f32 %v1974_v23, %v640_v53 }
 0x147   : > { %v568_v56 = vpop.f32.mrf.mxu3  ;;  %v696_v62 = vmax.f32 %v680_v59, 0.0 }
 0x14a   : > { %v541_v57 = vpop.f32.mrf.mxu0  ;;  %v641_v58 = vpop.f32.mrf.mxu1 }
 0x14b   : > { %v642_v60 = vadd.f32 %v641_v58, %v538_v49 }
 0x14d   : > { %v681_v61 = vadd.f32 %v1974_v23, %v642_v60 }
 0x14f   : > { %v697_v63 = vmax.f32 %v681_v61, 0.0  ;;  %v664_v0 = vpop.f32.mrf.mxu3 }
 0x150   : > { %v665_v4 = vadd.f32 %v664_v0, %v561_v16 }
 0x151   : > { %v711_v1 = vpack.c.bf16 %v697_v63, %v696_v62 }
 0x152   : > { %v543_v2 = vpop.f32.mrf.mxu0  ;;  %v644_v3 = vpop.f32.mrf.mxu1  ;;  %v690_v8 = vadd.f32 %v1974_v23, %v665_v4 }
 0x153   : > { %1445 = vmatmul.msk.bf16.gmra.mxu2 %vm497_vm0, %v711_v1  ;;  %v645_v5 = vadd.f32 %v644_v3, %v541_v57 }
 0x154   : > { %v706_v20 = vmax.f32 %v690_v8, 0.0 }
 0x155   : > { %v682_v17 = vadd.f32 %v1974_v23, %v645_v5 }
 0x157   : > { %v666_v6 = vpop.f32.mrf.mxu3  ;;  %v698_v33 = vmax.f32 %v682_v17, 0.0 }
 0x158   : > { %v667_v9 = vadd.f32 %v666_v6, %v563_v19 }
 0x15a   : > { %v691_v11 = vadd.f32 %v1974_v23, %v667_v9  ;;  %v546_v12 = vpop.f32.mrf.mxu0  ;;  %v646_v13 = vpop.f32.mrf.mxu1  ;;  %v435_v9 = vmul.f32 %v1873_v24, %v1888_v31 }
 0x15b   : > { %v647_v18 = vadd.f32 %v646_v13, %v543_v2  ;;  %v436_v13 = vmul.f32 %v1875_v25, %v1890_v32 }
 0x15c   : > { %v707_v26 = vmax.f32 %v691_v11, 0.0 }
 0x15d   : > { %v683_v27 = vadd.f32 %v1974_v23, %v647_v18 }
 0x15e   : > { %v716_v30 = vpack.c.bf16 %v707_v26, %v706_v20  ;;  %v437_v26 = vmul.f32 %v1895_v34, %v1905_v38 }
 0x15f   : > { %v699_v36 = vmax.f32 %v683_v27, 0.0  ;;  %v669_v16 = vpop.f32.mrf.mxu3 }
 0x160   : > { %1450 = vmatmul.msk.bf16.vlgmr.msra.gmra.mxu3 %vm497_vm0, %v716_v30  ;;  %v670_v44 = vadd.f32 %v669_v16, %v566_v43 }
 0x161   : > { %v712_v37 = vpack.c.bf16 %v699_v36, %v698_v33 }
 0x162   : > { %v548_v40 = vpop.f32.mrf.mxu0  ;;  %v649_v19 = vpop.f32.mrf.mxu1  ;;  %v692_v53 = vadd.f32 %v1974_v23, %v670_v44 }
 0x163   : > { %1446 = vmatmul.msk.bf16.gmra.mxu2 %vm497_vm0, %v712_v37  ;;  %v650_v49 = vadd.f32 %v649_v19, %v546_v12 }
 0x164   : > { %v708_v62 = vmax.f32 %v692_v53, 0.0 }
 0x165   : > { %v684_v60 = vadd.f32 %v1974_v23, %v650_v49 }
 0x167   : > { %v671_v52 = vpop.f32.mrf.mxu3  ;;  %v700_v3 = vmax.f32 %v684_v60, 0.0 }
 0x168   : > { %v672_v57 = vadd.f32 %v671_v52, %v568_v56  ;;  %v1997_v56 = vld [vmem:[%s2252_s10] ss:$0 sm:$0xff] }
 0x169   : > { %v892_v6 = vmul.f32 %v1997_v56, %v1863_v14  ;;  %v893_v8 = vmul.f32 %v1997_v56, %v1865_v15  ;;  %v894_v12 = vmul.f32 %v1997_v56, %v1858_v7  ;;  %v895_v15 = vmul.f32 %v1997_v56, %v1860_v10 }
 0x16a   : > { %v693_v58 = vadd.f32 %v1974_v23, %v672_v57  ;;  %v651_v59 = vpop.f32.mrf.mxu1  ;;  %v551_v0 = vpop.f32.mrf.mxu0  ;;  %v896_v24 = vmul.f32 %v1997_v56, %v435_v9  ;;  %v897_v7 = vmul.f32 %v1997_v56, %v436_v13  ;;  %v438_v10 = vmul.f32 %v1897_v35, %v1907_v39 }
 0x16b   : > { %v652_v61 = vadd.f32 %v651_v59, %v548_v40  ;;  %v908_v18 = vsel %vm839_vm1, %v892_v6, 0.0  ;;  %v911_v20 = vsel %vm839_vm1, %v893_v8, 0.0  ;;  %v914_v14 = vsel %vm839_vm1, %v894_v12, 0.0  ;;  %v2061_v8 = vld [vmem:[%s2251_s9] ss:$0 sm:$0xff] }
 0x16c   : > { %v709_v63 = vmax.f32 %v693_v58, 0.0  ;;  %909 = vadd.xlane.f32.xlu1 %v908_v18  ;;  %912 = vadd.xlane.f32.xlu2 %v911_v20  ;;  %v917_v30 = vsel %vm839_vm1, %v895_v15, 0.0  ;;  %v920_v33 = vsel %vm839_vm1, %v896_v24, 0.0  ;;  %v923_v36 = vsel %vm839_vm1, %v897_v7, 0.0 }
 0x16d   : > { %v685_v1 = vadd.f32 %v1974_v23, %v652_v61  ;;  %915 = vadd.xlane.f32.xlu0 %v914_v14  ;;  %v898_v44 = vmul.f32 %v1997_v56, %v437_v26  ;;  %v899_v34 = vmul.f32 %v1997_v56, %v438_v10  ;;  %v440_v35 = vmul.f32 %v1912_v42, %v1926_v48 }
 0x16e   : > { %v717_v2 = vpack.c.bf16 %v709_v63, %v708_v62  ;;  %v904_v48 = vmul.f32 %v1997_v56, %v1868_v21  ;;  %v442_v21 = vmul.f32 %v1933_v51, %v1943_v55 }
 0x16f   : > { %v701_v4 = vmax.f32 %v685_v1, 0.0  ;;  %v926_v49 = vsel %vm839_vm1, %v898_v44, 0.0  ;;  %v929_v39 = vsel %vm839_vm1, %v899_v34, 0.0  ;;  %v901_v53 = vmul.f32 %v1997_v56, %v440_v35 }
 0x170   : > { %1451 = vmatmul.msk.bf16.gmra.mxu3 %vm497_vm0, %v717_v2  ;;  %v944_v1 = vsel %vm839_vm1, %v904_v48, 0.0  ;;  %v441_v2 = vmul.f32 %v1931_v50, %v1941_v54  ;;  %v903_v6 = vmul.f32 %v1997_v56, %v442_v21 }
 0x171   : > { %v713_v43 = vpack.c.bf16 %v701_v4, %v700_v3  ;;  %v935_v62 = vsel %vm839_vm1, %v901_v53, 0.0 }
 0x172   : > { %v654_v5 = vpop.f32.mrf.mxu1  ;;  %v553_v11 = vpop.f32.mrf.mxu0  ;;  %v902_v3 = vmul.f32 %v1997_v56, %v441_v2  ;;  %v941_v50 = vsel %vm839_vm1, %v903_v6, 0.0 }
 0x173   : > { %1447 = vmatmul.msk.bf16.gmra.mxu2 %vm497_vm0, %v713_v43  ;;  %v655_v17 = vadd.f32 %v654_v5, %v551_v0 }
 0x174   : > { %918 = vadd.xlane.f32.xlu1 %v917_v30  ;;  %921 = vadd.xlane.f32.xlu2 %v920_v33  ;;  %v938_v43 = vsel %vm839_vm1, %v902_v3, 0.0 }
 0x175   : > { %v686_v25 = vadd.f32 %v1974_v23, %v655_v17  ;;  %924 = vadd.xlane.f32.xlu0 %v923_v36 }
 0x177   : > { %v702_v16 = vmax.f32 %v686_v25, 0.0 }
 0x17a   : > { %v656_v31 = vpop.f32.mrf.mxu1  ;;  %v556_v40 = vpop.f32.mrf.mxu0 }
 0x17b   : > { %v657_v32 = vadd.f32 %v656_v31, %v553_v11 }
 0x17c   : > { %927 = vadd.xlane.f32.xlu1 %v926_v49  ;;  %930 = vadd.xlane.f32.xlu2 %v929_v39 }
 0x17d   : > { %v687_v27 = vadd.f32 %v1974_v23, %v657_v32 }
 0x17f   : > { %v703_v37 = vmax.f32 %v687_v27, 0.0 }
 0x181   : > { %v714_v19 = vpack.c.bf16 %v703_v37, %v702_v16 }
 0x182   : > { %v659_v38 = vpop.f32.mrf.mxu1  ;;  %v558_v57 = vpop.f32.mrf.mxu0 }
 0x183   : > { %1448 = vmatmul.msk.bf16.gmra.mxu2 %vm497_vm0, %v714_v19  ;;  %v660_v52 = vadd.f32 %v659_v38, %v556_v40 }
 0x184   : > { %936 = vadd.xlane.f32.xlu1 %v935_v62  ;;  %939 = vadd.xlane.f32.xlu2 %v938_v43 }
 0x185   : > { %v688_v59 = vadd.f32 %v1974_v23, %v660_v52 }
 0x187   : > { %v704_v63 = vmax.f32 %v688_v59, 0.0 }
 0x18a   : > { %v661_v58 = vpop.f32.mrf.mxu1 }
 0x18b   : > { %v662_v60 = vadd.f32 %v661_v58, %v558_v57 }
 0x18c   : > { %945 = vadd.xlane.f32.xlu1 %v944_v1 }
 0x18d   : > { %v689_v61 = vadd.f32 %v1974_v23, %v662_v60  ;;  %v439_v23 = vmul.f32 %v1910_v41, %v1924_v47  ;;  %v2055_v41 = vld [vmem:[%s2250_s8] ss:$0 sm:$0xff] }
 0x18f   : > { %v705_v0 = vmax.f32 %v689_v61, 0.0  ;;  %v900_v4 = vmul.f32 %v1997_v56, %v439_v23 }
 0x191   : > { %v715_v42 = vpack.c.bf16 %v705_v0, %v704_v63  ;;  %v932_v5 = vsel %vm839_vm1, %v900_v4, 0.0 }
 0x192   : > { %933 = vadd.xlane.f32.xlu0 %v932_v5 }
 0x193   : > { %1449 = vmatmul.msk.bf16.gmra.mxu2 %vm497_vm0, %v715_v42 }
 0x19a   : > { %942 = vadd.xlane.f32.xlu0 %v941_v50 }
 0x1c6   : > { %v763_v47 = vpop.f32.mrf.mxu2 }
 0x1c7   : > { %v764_v54 = vadd.f32 %v2055_v41, %v763_v47 }
 0x1c9   : > { %v803_v9 = vmax.f32 %v764_v54, 0.0 }
 0x1cb   : > { %v823_v51 = vmul.f32 %v2061_v8, %v803_v9 }
 0x1cd   : > { %v840_v55 = vsel %vm839_vm1, %v823_v51, 0.0 }
 0x1ce   : > { %v765_v11 = vpop.f32.mrf.mxu2  ;;  %841 = vadd.xlane.f32.xlu1 %v840_v55 }
 0x1cf   : > { %v766_v12 = vadd.f32 %v2055_v41, %v765_v11 }
 0x1d1   : > { %v804_v13 = vmax.f32 %v766_v12, 0.0 }
 0x1d3   : > { %v824_v17 = vmul.f32 %v2061_v8, %v804_v13 }
 0x1d5   : > { %v843_v18 = vsel %vm839_vm1, %v824_v17, 0.0 }
 0x1d6   : > { %v768_v20 = vpop.f32.mrf.mxu2  ;;  %844 = vadd.xlane.f32.xlu2 %v843_v18 }
 0x1d7   : > { %v769_v14 = vadd.f32 %v2055_v41, %v768_v20 }
 0x1d9   : > { %v805_v15 = vmax.f32 %v769_v14, 0.0 }
 0x1db   : > { %v825_v24 = vmul.f32 %v2061_v8, %v805_v15 }
 0x1dd   : > { %v846_v31 = vsel %vm839_vm1, %v825_v24, 0.0 }
 0x1de   : > { %v770_v7 = vpop.f32.mrf.mxu2  ;;  %847 = vadd.xlane.f32.xlu0 %v846_v31  ;;  %v445_v31 = vmul.f32 %v1881_v28, %v1919_v45 }
 0x1df   : > { %v771_v25 = vadd.f32 %v2055_v41, %v770_v7  ;;  %v910_v14 = vpop.xlane.xlu1 %909 }
 0x1e1   : > { %v806_v32 = vmax.f32 %v771_v25, 0.0 }
 0x1e3   : > { %v793_v26 = vpop.f32.mrf.mxu3  ;;  %v826_v27 = vmul.f32 %v2061_v8, %v806_v32 }
 0x1e4   : > { %v794_v30 = vadd.f32 %v2055_v41, %v793_v26  ;;  %v906_v26 = vmul.f32 %v1997_v56, %v445_v31 }
 0x1e5   : > { %v849_v33 = vsel %vm839_vm1, %v826_v27, 0.0 }
 0x1e6   : > { %v815_v10 = vmax.f32 %v794_v30, 0.0  ;;  %850 = vadd.xlane.f32.xlu2 %v849_v33  ;;  %v773_v36 = vpop.f32.mrf.mxu2  ;;  %v950_v33 = vsel %vm839_vm1, %v906_v26, 0.0 }
 0x1e7   : > { %v774_v16 = vadd.f32 %v2055_v41, %v773_v36  ;;  %v919_v30 = vpop.xlane.xlu1 %918  ;;  %v446_v36 = vmul.f32 %v1883_v29, %v1921_v46  ;;  %v905_v29 = vmul.f32 %v1997_v56, %v1870_v22  ;;  %v916_v46 = vpop.xlane.xlu0 %915 }
 0x1e8   : > { %v835_v37 = vmul.f32 %v2061_v8, %v815_v10 }
 0x1e9   : > { %v807_v40 = vmax.f32 %v774_v16, 0.0 }
 0x1ea   : > { %v876_v19 = vsel %vm839_vm1, %v835_v37, 0.0  ;;  %v907_v37 = vmul.f32 %v1997_v56, %v446_v36 }
 0x1eb   : > { %v795_v44 = vpop.f32.mrf.mxu3  ;;  %877 = vadd.xlane.f32.xlu0 %v876_v19  ;;  %v827_v34 = vmul.f32 %v2061_v8, %v807_v40  ;;  %v913_v19 = vpop.xlane.xlu2 %912 }
 0x1ec   : > { %v796_v38 = vadd.f32 %v2055_v41, %v795_v44 }
 0x1ed   : > { %v852_v49 = vsel %vm839_vm1, %v827_v34, 0.0  ;;  %v953_v34 = vsel %vm839_vm1, %v907_v37, 0.0 }
 0x1ee   : > { %v816_v35 = vmax.f32 %v796_v38, 0.0  ;;  %v775_v39 = vpop.f32.mrf.mxu2  ;;  %853 = vadd.xlane.f32.xlu1 %v852_v49 }
 0x1ef   : > { %v776_v52 = vadd.f32 %v2055_v41, %v775_v39  ;;  %v2117_v38 = vpop.xlane.xlu1 %927 }
 0x1f0   : > { %v836_v57 = vmul.f32 %v2061_v8, %v816_v35 }
 0x1f1   : > { %v808_v53 = vmax.f32 %v776_v52, 0.0  ;;  %v2125_v52 = vpop.xlane.xlu0 %924 }
 0x1f2   : > { %v879_v62 = vsel %vm839_vm1, %v836_v57, 0.0 }
 0x1f3   : > { %v798_v58 = vpop.f32.mrf.mxu3  ;;  %v828_v59 = vmul.f32 %v2061_v8, %v808_v53  ;;  %v922_v35 = vpop.xlane.xlu2 %921 }
 0x1f4   : > { %v799_v60 = vadd.f32 %v2055_v41, %v798_v58 }
 0x1f5   : > { %v855_v61 = vsel %vm839_vm1, %v828_v59, 0.0  ;;  %v2133_v59 = vstv %s972_s28 }
 0x1f6   : > { %v817_v63 = vmax.f32 %v799_v60, 0.0  ;;  %856 = vadd.xlane.f32.xlu2 %v855_v61  ;;  %v778_v0 = vpop.f32.mrf.mxu2  ;;  %880 = vadd.xlane.f32.xlu1 %v879_v62 }
 0x1f7   : > { %v779_v42 = vadd.f32 %v2055_v41, %v778_v0  ;;  %v2123_v39 = vpop.xlane.xlu1 %936 }
 0x1f8   : > { %v837_v1 = vmul.f32 %v2061_v8, %v817_v63 }
 0x1f9   : > { %v809_v48 = vmax.f32 %v779_v42, 0.0 }
 0x1fa   : > { %v882_v4 = vsel %vm839_vm1, %v837_v1, 0.0 }
 0x1fb   : > { %v800_v2 = vpop.f32.mrf.mxu3  ;;  %v829_v23 = vmul.f32 %v2061_v8, %v809_v48 }
 0x1fc   : > { %v801_v3 = vadd.f32 %v2055_v41, %v800_v2 }
 0x1fd   : > { %v858_v43 = vsel %vm839_vm1, %v829_v23, 0.0 }
 0x1fe   : > { %v818_v5 = vmax.f32 %v801_v3, 0.0  ;;  %883 = vadd.xlane.f32.xlu2 %v882_v4  ;;  %v780_v21 = vpop.f32.mrf.mxu2  ;;  %859 = vadd.xlane.f32.xlu0 %v858_v43 }
 0x1ff   : > { %v781_v6 = vadd.f32 %v2055_v41, %v780_v21  ;;  %v946_v53 = vpop.xlane.xlu1 %945 }
 0x200   : > { %v838_v47 = vmul.f32 %v2061_v8, %v818_v5 }
 0x201   : > { %v810_v50 = vmax.f32 %v781_v6, 0.0 }
 0x202   : > { %v885_v9 = vsel %vm839_vm1, %v838_v47, 0.0 }
 0x203   : > { %v830_v54 = vmul.f32 %v2061_v8, %v810_v50 }
 0x205   : > { %v861_v51 = vsel %vm839_vm1, %v830_v54, 0.0  ;;  %v2129_v57 = vpop.xlane.xlu0 %933 }
 0x206   : > { %886 = vadd.xlane.f32.xlu0 %v885_v9  ;;  %v783_v55 = vpop.f32.mrf.mxu2  ;;  %862 = vadd.xlane.f32.xlu1 %v861_v51 }
 0x207   : > { %v784_v11 = vadd.f32 %v2055_v41, %v783_v55 }
 0x209   : > { %v811_v12 = vmax.f32 %v784_v11, 0.0 }
 0x20b   : > { %v831_v13 = vmul.f32 %v2061_v8, %v811_v12 }
 0x20d   : > { %v864_v17 = vsel %vm839_vm1, %v831_v13, 0.0  ;;  %v2136_v62 = vpop.xlane.xlu0 %942 }
 0x20e   : > { %v785_v18 = vpop.f32.mrf.mxu2  ;;  %865 = vadd.xlane.f32.xlu2 %v864_v17 }
 0x20f   : > { %v786_v20 = vadd.f32 %v2055_v41, %v785_v18 }
 0x211   : > { %v812_v15 = vmax.f32 %v786_v20, 0.0 }
 0x213   : > { %v832_v24 = vmul.f32 %v2061_v8, %v812_v15 }
 0x215   : > { %v867_v7 = vsel %vm839_vm1, %v832_v24, 0.0 }
 0x216   : > { %868 = vadd.xlane.f32.xlu0 %v867_v7  ;;  %v788_v25 = vpop.f32.mrf.mxu2 }
 0x217   : > { %v789_v32 = vadd.f32 %v2055_v41, %v788_v25 }
 0x219   : > { %v813_v27 = vmax.f32 %v789_v32, 0.0 }
 0x21b   : > { %v833_v10 = vmul.f32 %v2061_v8, %v813_v27 }
 0x21d   : > { %v870_v16 = vsel %vm839_vm1, %v833_v10, 0.0 }
 0x21e   : > { %951 = vadd.xlane.f32.xlu0 %v950_v33  ;;  %v790_v28 = vpop.f32.mrf.mxu2  ;;  %871 = vadd.xlane.f32.xlu1 %v870_v16 }
 0x21f   : > { %v791_v45 = vadd.f32 %v2055_v41, %v790_v28  ;;  %v947_v41 = vsel %vm839_vm1, %v905_v29, 0.0 }
 0x221   : > { %v814_v40 = vmax.f32 %v791_v45, 0.0 }
 0x223   : > { %v834_v44 = vmul.f32 %v2061_v8, %v814_v40  ;;  %v2127_v8 = vpop.xlane.xlu2 %930 }
 0x225   : > { %v873_v49 = vsel %vm839_vm1, %v834_v44, 0.0 }
 0x226   : > { %874 = vadd.xlane.f32.xlu2 %v873_v49  ;;  %954 = vadd.xlane.f32.xlu1 %v953_v34 }
 0x22b   : > { %v2131_v58 = vpop.xlane.xlu2 %939 }
 0x22e   : > { %948 = vadd.xlane.f32.xlu2 %v947_v41 }
 0x241   : > { %v842_v22 = vpop.xlane.xlu1 %841 }
 0x242   : > { %v956_v56 = vadd.f32 %v910_v14, %v842_v22 }
 0x244   : > { %v974_v60 = vadd.f32 %v2133_v59, %v956_v56 }
 0x246   : > { %v1452_v61 = vmul.f32 -1.442695, %v974_v60 }
 0x248   : > { %1546 = vpow2.f32 %v1452_v61 }
 0x249   : > { %v845_v63 = vpop.xlane.xlu2 %844 }
 0x24a   : > { %v957_v0 = vadd.f32 %v913_v19, %v845_v63 }
 0x24c   : > { %v975_v42 = vadd.f32 %v2133_v59, %v957_v0 }
 0x24e   : > { %v1547_v48 = vpop.eup %1546  ;;  %v1453_v1 = vmul.f32 -1.442695, %v975_v42 }
 0x24f   : > { %v1038_v2 = vadd.f32 1.0, %v1547_v48 }
 0x250   : > { %1548 = vpow2.f32 %v1453_v1 }
 0x251   : > { %1550 = vrcp.f32 %v1038_v2  ;;  %v848_v23 = vpop.xlane.xlu0 %847  ;;  %v1065_v51 = vand.u32 2147483648, %v1038_v2  ;;  %v1063_v11 = vand.u32 2147483647, %v1038_v2  ;;  %vm1059_vm3 = vweird.f32 %v1038_v2 }
 0x252   : > { %v958_v3 = vadd.f32 %v916_v46, %v848_v23 }
 0x253   : > { %v1066_v15 = vor.u32 1.1754944e-38, %v1065_v51  ;;  %vm1064_vm5 = vcmp.eq.f32.partialorder %v1063_v11, 8.507059e+37 }
 0x254   : > { %v976_v4 = vadd.f32 %v2133_v59, %v958_v3 }
 0x256   : > { %v1549_v43 = vpop.eup %1548  ;;  %v1454_v5 = vmul.f32 -1.442695, %v976_v4 }
 0x257   : > { %v1551_v21 = vpop.eup %1550  ;;  %v1039_v6 = vadd.f32 1.0, %v1549_v43 }
 0x258   : > { %v1055_v50 = vmul.f32 %v1551_v21, %v1038_v2  ;;  %1552 = vpow2.f32 %v1454_v5  ;;  %vm1060_vm2 = vweird.f32 %v1551_v21 }
 0x259   : > { %1554 = vrcp.f32 %v1039_v6  ;;  %v851_v47 = vpop.xlane.xlu2 %850  ;;  %vm1061_vm4 = vmor %vm1059_vm3, %vm1060_vm2  ;;  %v1078_v10 = vand.u32 2147483647, %v1039_v6  ;;  %v1080_v36 = vand.u32 2147483648, %v1039_v6  ;;  %vm1074_vm7 = vweird.f32 %v1039_v6 }
 0x25a   : > { %v1056_v54 = vsub.f32 1.0, %v1055_v50  ;;  %v959_v9 = vadd.f32 %v919_v30, %v851_v47 }
 0x25b   : > { %v1081_v34 = vor.u32 1.1754944e-38, %v1080_v36  ;;  %vm1079_vm9 = vcmp.eq.f32.partialorder %v1078_v10, 8.507059e+37 }
 0x25c   : > { %v1057_v55 = vmul.f32 %v1551_v21, %v1056_v54  ;;  %v977_v12 = vadd.f32 %v2133_v59, %v959_v9 }
 0x25e   : > { %v1553_v13 = vpop.eup %1552  ;;  %v1058_v17 = vadd.f32 %v1551_v21, %v1057_v55  ;;  %v1455_v18 = vmul.f32 -1.442695, %v977_v12  ;;  %v878_v20 = vpop.xlane.xlu0 %877 }
 0x25f   : > { %v1555_v14 = vpop.eup %1554  ;;  %v1040_v24 = vadd.f32 1.0, %v1553_v13  ;;  %v968_v31 = vadd.f32 %v946_v53, %v878_v20 }
 0x260   : > { %v1062_v7 = vsel %vm1061_vm4, %v1551_v21, %v1058_v17  ;;  %v1070_v25 = vmul.f32 %v1555_v14, %v1039_v6  ;;  %1556 = vpow2.f32 %v1455_v18  ;;  %vm1075_vm6 = vweird.f32 %v1555_v14 }
 0x261   : > { %v1067_v32 = vsel %vm1064_vm5, %v1066_v15, %v1062_v7  ;;  %1558 = vrcp.f32 %v1040_v24  ;;  %v854_v26 = vpop.xlane.xlu1 %853  ;;  %v986_v30 = vadd.f32 %v2133_v59, %v968_v31  ;;  %vm1076_vm8 = vmor %vm1074_vm7, %vm1075_vm6  ;;  %v1095_v56 = vand.u32 2147483648, %v1040_v24 }
 0x262   : > { %1294 = vst [vmem:[%s1849_s25] sm:$0xff] %v1067_v32  ;;  %v1071_v27 = vsub.f32 1.0, %v1070_v25  ;;  %v960_v33 = vadd.f32 %v922_v35, %v854_v26  ;;  %v1093_v63 = vand.u32 2147483647, %v1040_v24  ;;  %vm1089_vm11 = vweird.f32 %v1040_v24 }
 0x263   : > { %v1464_v28 = vmul.f32 -1.442695, %v986_v30  ;;  %v1096_v3 = vor.u32 1.1754944e-38, %v1095_v56 }
 0x264   : > { %v1072_v16 = vmul.f32 %v1555_v14, %v1071_v27  ;;  %v978_v45 = vadd.f32 %v2133_v59, %v960_v33  ;;  %vm1094_vm13 = vcmp.eq.f32.partialorder %v1093_v63, 8.507059e+37 }
 0x265   : > { %1560 = vpow2.f32 %v1464_v28 }
 0x266   : > { %v1557_v37 = vpop.eup %1556  ;;  %v1073_v40 = vadd.f32 %v1555_v14, %v1072_v16  ;;  %v1456_v19 = vmul.f32 -1.442695, %v978_v45 }
 0x267   : > { %v1559_v44 = vpop.eup %1558  ;;  %v1041_v49 = vadd.f32 1.0, %v1557_v37 }
 0x268   : > { %v1077_v29 = vsel %vm1076_vm8, %v1555_v14, %v1073_v40  ;;  %v1085_v46 = vmul.f32 %v1559_v44, %v1040_v24  ;;  %1562 = vpow2.f32 %v1456_v19  ;;  %vm1090_vm10 = vweird.f32 %v1559_v44 }
 0x269   : > { %v1082_v41 = vsel %vm1079_vm9, %v1081_v34, %v1077_v29  ;;  %1564 = vrcp.f32 %v1041_v49  ;;  %v857_v35 = vpop.xlane.xlu2 %856  ;;  %vm1091_vm12 = vmor %vm1089_vm11, %vm1090_vm10  ;;  %v2152_v21 = vpop.xlane.xlu1 %880  ;;  %v1108_v47 = vand.u32 2147483647, %v1041_v49  ;;  %v1110_v54 = vand.u32 2147483648, %v1041_v49 }
 0x26a   : > { %1295 = vst [vmem:[%s1849_s25 + $0x8] sm:$0xff] %v1082_v41  ;;  %v1086_v53 = vsub.f32 1.0, %v1085_v46  ;;  %v961_v22 = vadd.f32 %v2125_v52, %v857_v35  ;;  %vm1104_vm15 = vweird.f32 %v1041_v49 }
 0x26b   : > { %v1561_v60 = vpop.eup %1560  ;;  %vm1109_vm1 = vcmp.eq.f32.partialorder %v1108_v47, 8.507059e+37  ;;  %v1111_v18 = vor.u32 1.1754944e-38, %v1110_v54 }
 0x26c   : > { %v1087_v61 = vmul.f32 %v1559_v44, %v1086_v53  ;;  %v979_v0 = vadd.f32 %v2133_v59, %v961_v22  ;;  %v2147_v42 = vadd.f32 1.0, %v1561_v60 }
 0x26e   : > { %v1563_v48 = vpop.eup %1562  ;;  %v1088_v1 = vadd.f32 %v1559_v44, %v1087_v61  ;;  %v1457_v2 = vmul.f32 -1.442695, %v979_v0  ;;  %1566 = vrcp.f32 %v2147_v42  ;;  %v1243_v30 = vand.u32 2147483647, %v2147_v42 }
 0x26f   : > { %v1565_v23 = vpop.eup %1564  ;;  %v2150_v43 = vadd.f32 1.0, %v1563_v48  ;;  %vm1239_vm3 = vweird.f32 %v2147_v42 }
 0x270   : > { %v1092_v52 = vsel %vm1091_vm12, %v1559_v44, %v1088_v1  ;;  %v1100_v4 = vmul.f32 %v1565_v23, %v1041_v49  ;;  %1568 = vpow2.f32 %v1457_v2  ;;  %vm1105_vm14 = vweird.f32 %v1565_v23 }
 0x271   : > { %v1097_v5 = vsel %vm1094_vm13, %v1096_v3, %v1092_v52  ;;  %v860_v6 = vpop.xlane.xlu0 %859  ;;  %1570 = vrcp.f32 %v2150_v43  ;;  %vm1106_vm0 = vmor %vm1104_vm15, %vm1105_vm14  ;;  %v2161_v32 = vpop.xlane.xlu2 %883  ;;  %v1125_v28 = vand.u32 2147483648, %v2150_v43  ;;  %v1123_v37 = vand.u32 2147483647, %v2150_v43 }
 0x272   : > { %1296 = vst [vmem:[%s1849_s25 + $0x10] sm:$0xff] %v1097_v5  ;;  %v1101_v50 = vsub.f32 1.0, %v1100_v4  ;;  %v962_v9 = vadd.f32 %v2117_v38, %v860_v6  ;;  %v1245_v38 = vand.u32 2147483648, %v2147_v42  ;;  %vm1244_vm6 = vcmp.eq.f32.partialorder %v1243_v30, 8.507059e+37 }
 0x273   : > { %vm1119_vm7 = vweird.f32 %v2150_v43  ;;  %v1126_v46 = vor.u32 1.1754944e-38, %v1125_v28  ;;  %vm1124_vm9 = vcmp.eq.f32.partialorder %v1123_v37, 8.507059e+37 }
 0x274   : > { %v1102_v51 = vmul.f32 %v1565_v23, %v1101_v50  ;;  %v1567_v55 = vpop.eup %1566  ;;  %v980_v11 = vadd.f32 %v2133_v59, %v962_v9  ;;  %v1246_v16 = vor.u32 1.1754944e-38, %v1245_v38 }
 0x275   : > { %v1235_v13 = vmul.f32 %v1567_v55, %v2147_v42  ;;  %vm1240_vm2 = vweird.f32 %v1567_v55 }
 0x276   : > { %v1103_v12 = vadd.f32 %v1565_v23, %v1102_v51  ;;  %v1569_v17 = vpop.eup %1568  ;;  %v1458_v20 = vmul.f32 -1.442695, %v980_v11  ;;  %vm1241_vm4 = vmor %vm1239_vm3, %vm1240_vm2 }
 0x277   : > { %v1571_v14 = vpop.eup %1570  ;;  %v1236_v24 = vsub.f32 1.0, %v1235_v13  ;;  %v1043_v31 = vadd.f32 1.0, %v1569_v17 }
 0x278   : > { %v1107_v15 = vsel %vm1106_vm0, %v1565_v23, %v1103_v12  ;;  %v1115_v25 = vmul.f32 %v1571_v14, %v2150_v43  ;;  %1572 = vpow2.f32 %v1458_v20  ;;  %vm1120_vm5 = vweird.f32 %v1571_v14 }
 0x279   : > { %v1112_v7 = vsel %vm1109_vm1, %v1111_v18, %v1107_v15  ;;  %v863_v26 = vpop.xlane.xlu1 %862  ;;  %v1237_v27 = vmul.f32 %v1567_v55, %v1236_v24  ;;  %1574 = vrcp.f32 %v1043_v31  ;;  %vm1121_vm8 = vmor %vm1119_vm7, %vm1120_vm5  ;;  %v2172_v22 = vpop.xlane.xlu0 %886  ;;  %v1140_v0 = vand.u32 2147483648, %v1043_v31 }
 0x27a   : > { %1297 = vst [vmem:[%s1849_s25 + $0x18] sm:$0xff] %v1112_v7  ;;  %v1116_v33 = vsub.f32 1.0, %v1115_v25  ;;  %v963_v10 = vadd.f32 %v2127_v8, %v863_v26  ;;  %v1138_v48 = vand.u32 2147483647, %v1043_v31  ;;  %vm1134_vm11 = vweird.f32 %v1043_v31 }
 0x27b   : > { %v1238_v36 = vadd.f32 %v1567_v55, %v1237_v27  ;;  %v1141_v4 = vor.u32 1.1754944e-38, %v1140_v0 }
 0x27c   : > { %v1117_v45 = vmul.f32 %v1571_v14, %v1116_v33  ;;  %v981_v40 = vadd.f32 %v2133_v59, %v963_v10  ;;  %vm1139_vm13 = vcmp.eq.f32.partialorder %v1138_v48, 8.507059e+37 }
 0x27d   : > { %v1242_v19 = vsel %vm1241_vm4, %v1567_v55, %v1238_v36 }
 0x27e   : > { %v1573_v44 = vpop.eup %1572  ;;  %v1247_v34 = vsel %vm1244_vm6, %v1246_v16, %v1242_v19  ;;  %v1118_v49 = vadd.f32 %v1571_v14, %v1117_v45  ;;  %v1459_v8 = vmul.f32 -1.442695, %v981_v40 }
 0x27f   : > { %v1575_v29 = vpop.eup %1574  ;;  %1306 = vst [vmem:[%s1849_s25 + $0x60] sm:$0xff] %v1247_v34  ;;  %v1044_v41 = vadd.f32 1.0, %v1573_v44 }
 0x280   : > { %v1122_v35 = vsel %vm1121_vm8, %v1571_v14, %v1118_v49  ;;  %v1130_v53 = vmul.f32 %v1575_v29, %v1043_v31  ;;  %1576 = vpow2.f32 %v1459_v8  ;;  %vm1135_vm10 = vweird.f32 %v1575_v29 }
 0x281   : > { %v866_v56 = vpop.xlane.xlu2 %865  ;;  %v1127_v60 = vsel %vm1124_vm9, %v1126_v46, %v1122_v35  ;;  %1578 = vrcp.f32 %v1044_v41  ;;  %vm1136_vm12 = vmor %vm1134_vm11, %vm1135_vm10  ;;  %v1155_v9 = vand.u32 2147483648, %v1044_v41  ;;  %v1153_v55 = vand.u32 2147483647, %v1044_v41 }
 0x282   : > { %1298 = vst [vmem:[%s1849_s25 + $0x20] sm:$0xff] %v1127_v60  ;;  %v1131_v61 = vsub.f32 1.0, %v1130_v53  ;;  %v964_v63 = vadd.f32 %v2129_v57, %v866_v56  ;;  %vm1149_vm15 = vweird.f32 %v1044_v41 }
 0x283   : > { %v1156_v20 = vor.u32 1.1754944e-38, %v1155_v9  ;;  %vm1154_vm1 = vcmp.eq.f32.partialorder %v1153_v55, 8.507059e+37 }
 0x284   : > { %v1132_v42 = vmul.f32 %v1575_v29, %v1131_v61  ;;  %v982_v1 = vadd.f32 %v2133_v59, %v964_v63 }
 0x286   : > { %v1577_v2 = vpop.eup %1576  ;;  %v1133_v23 = vadd.f32 %v1575_v29, %v1132_v42  ;;  %v1460_v3 = vmul.f32 -1.442695, %v982_v1 }
 0x287   : > { %v1579_v52 = vpop.eup %1578  ;;  %v1045_v43 = vadd.f32 1.0, %v1577_v2 }
 0x288   : > { %v1137_v5 = vsel %vm1136_vm12, %v1575_v29, %v1133_v23  ;;  %v1145_v6 = vmul.f32 %v1579_v52, %v1044_v41  ;;  %1580 = vpow2.f32 %v1460_v3  ;;  %vm1150_vm14 = vweird.f32 %v1579_v52 }
 0x289   : > { %v869_v57 = vpop.xlane.xlu0 %868  ;;  %v1142_v50 = vsel %vm1139_vm13, %v1141_v4, %v1137_v5  ;;  %1582 = vrcp.f32 %v1045_v43  ;;  %vm1151_vm0 = vmor %vm1149_vm15, %vm1150_vm14  ;;  %v1168_v27 = vand.u32 2147483647, %v1045_v43  ;;  %v1170_v30 = vand.u32 2147483648, %v1045_v43 }
 0x28a   : > { %1299 = vst [vmem:[%s1849_s25 + $0x28] sm:$0xff] %v1142_v50  ;;  %v1146_v47 = vsub.f32 1.0, %v1145_v6  ;;  %v965_v54 = vadd.f32 %v2123_v39, %v869_v57  ;;  %vm1164_vm3 = vweird.f32 %v1045_v43 }
 0x28b   : > { %v1171_v19 = vor.u32 1.1754944e-38, %v1170_v30  ;;  %vm1169_vm5 = vcmp.eq.f32.partialorder %v1168_v27, 8.507059e+37 }
 0x28c   : > { %v1147_v51 = vmul.f32 %v1579_v52, %v1146_v47  ;;  %v983_v11 = vadd.f32 %v2133_v59, %v965_v54 }
 0x28e   : > { %v1581_v12 = vpop.eup %1580  ;;  %v1148_v13 = vadd.f32 %v1579_v52, %v1147_v51  ;;  %v1461_v17 = vmul.f32 -1.442695, %v983_v11 }
 0x28f   : > { %v1583_v18 = vpop.eup %1582  ;;  %v1046_v14 = vadd.f32 1.0, %v1581_v12 }
 0x290   : > { %v1152_v15 = vsel %vm1151_vm0, %v1579_v52, %v1148_v13  ;;  %v1160_v24 = vmul.f32 %v1583_v18, %v1045_v43  ;;  %1584 = vpow2.f32 %v1461_v17  ;;  %vm1165_vm2 = vweird.f32 %v1583_v18 }
 0x291   : > { %v952_v39 = vpop.xlane.xlu0 %951  ;;  %v872_v38 = vpop.xlane.xlu1 %871  ;;  %v1157_v31 = vsel %vm1154_vm1, %v1156_v20, %v1152_v15  ;;  %1586 = vrcp.f32 %v1046_v14  ;;  %vm1166_vm4 = vmor %vm1164_vm3, %vm1165_vm2  ;;  %v1185_v41 = vand.u32 2147483648, %v1046_v14  ;;  %v1183_v56 = vand.u32 2147483647, %v1046_v14 }
 0x292   : > { %1300 = vst [vmem:[%s1849_s25 + $0x30] sm:$0xff] %v1157_v31  ;;  %v1161_v7 = vsub.f32 1.0, %v1160_v24  ;;  %v970_v25 = vadd.f32 %v952_v39, %v2161_v32  ;;  %v966_v26 = vadd.f32 %v2131_v58, %v872_v38  ;;  %vm1179_vm7 = vweird.f32 %v1046_v14 }
 0x293   : > { %v1186_v1 = vor.u32 1.1754944e-38, %v1185_v41  ;;  %vm1184_vm9 = vcmp.eq.f32.partialorder %v1183_v56, 8.507059e+37 }
 0x294   : > { %v1162_v33 = vmul.f32 %v1583_v18, %v1161_v7  ;;  %v988_v10 = vadd.f32 %v2133_v59, %v970_v25  ;;  %v984_v36 = vadd.f32 %v2133_v59, %v966_v26 }
 0x296   : > { %v1585_v16 = vpop.eup %1584  ;;  %v1163_v28 = vadd.f32 %v1583_v18, %v1162_v33  ;;  %v1466_v45 = vmul.f32 -1.442695, %v988_v10  ;;  %v1462_v37 = vmul.f32 -1.442695, %v984_v36 }
 0x297   : > { %v1587_v40 = vpop.eup %1586  ;;  %v1047_v32 = vadd.f32 1.0, %v1585_v16 }
 0x298   : > { %v1167_v44 = vsel %vm1166_vm4, %v1583_v18, %v1163_v28  ;;  %v1175_v58 = vmul.f32 %v1587_v40, %v1046_v14  ;;  %1588 = vpow2.f32 %v1466_v45  ;;  %vm1180_vm6 = vweird.f32 %v1587_v40 }
 0x299   : > { %v875_v34 = vpop.xlane.xlu2 %874  ;;  %v955_v49 = vpop.xlane.xlu1 %954  ;;  %v1172_v8 = vsel %vm1169_vm5, %v1171_v19, %v1167_v44  ;;  %1590 = vrcp.f32 %v1047_v32  ;;  %vm1181_vm8 = vmor %vm1179_vm7, %vm1180_vm6  ;;  %v1200_v6 = vand.u32 2147483648, %v1047_v32  ;;  %v1198_v47 = vand.u32 2147483647, %v1047_v32 }
 0x29a   : > { %1301 = vst [vmem:[%s1849_s25 + $0x38] sm:$0xff] %v1172_v8  ;;  %v1176_v29 = vsub.f32 1.0, %v1175_v58  ;;  %1592 = vpow2.f32 %v1462_v37  ;;  %v967_v46 = vadd.f32 %v2136_v62, %v875_v34  ;;  %v971_v35 = vadd.f32 %v955_v49, %v2172_v22 }
 0x29b   : > { %vm1194_vm11 = vweird.f32 %v1047_v32  ;;  %v1201_v11 = vor.u32 1.1754944e-38, %v1200_v6  ;;  %vm1199_vm13 = vcmp.eq.f32.partialorder %v1198_v47, 8.507059e+37 }
 0x29c   : > { %v1177_v53 = vmul.f32 %v1587_v40, %v1176_v29  ;;  %v985_v60 = vadd.f32 %v2133_v59, %v967_v46  ;;  %v989_v61 = vadd.f32 %v2133_v59, %v971_v35 }
 0x29e   : > { %v1589_v63 = vpop.eup %1588  ;;  %v1178_v0 = vadd.f32 %v1587_v40, %v1177_v53  ;;  %v1463_v42 = vmul.f32 -1.442695, %v985_v60  ;;  %v1467_v62 = vmul.f32 -1.442695, %v989_v61 }
 0x29f   : > { %v1591_v48 = vpop.eup %1590  ;;  %v1052_v2 = vadd.f32 1.0, %v1589_v63 }
 0x2a0   : > { %v1593_v23 = vpop.eup %1592  ;;  %v1182_v3 = vsel %vm1181_vm8, %v1587_v40, %v1178_v0  ;;  %v1190_v22 = vmul.f32 %v1591_v48, %v1047_v32  ;;  %1594 = vpow2.f32 %v1463_v42  ;;  %vm1195_vm10 = vweird.f32 %v1591_v48 }
 0x2a1   : > { %v949_v52 = vpop.xlane.xlu2 %948  ;;  %v1187_v4 = vsel %vm1184_vm9, %v1186_v1, %v1182_v3  ;;  %1596 = vrcp.f32 %v1052_v2  ;;  %v1048_v5 = vadd.f32 1.0, %v1593_v23  ;;  %vm1196_vm12 = vmor %vm1194_vm11, %vm1195_vm10  ;;  %v1275_v24 = vand.u32 2147483648, %v1052_v2 }
 0x2a2   : > { %1302 = vst [vmem:[%s1849_s25 + $0x40] sm:$0xff] %v1187_v4  ;;  %v1191_v43 = vsub.f32 1.0, %v1190_v22  ;;  %1598 = vpow2.f32 %v1467_v62  ;;  %v969_v57 = vadd.f32 %v949_v52, %v2152_v21  ;;  %v1273_v31 = vand.u32 2147483647, %v1052_v2 }
 0x2a3   : > { %1600 = vrcp.f32 %v1048_v5  ;;  %vm1269_vm15 = vweird.f32 %v1052_v2  ;;  %v1213_v26 = vand.u32 2147483647, %v1048_v5  ;;  %v1215_v27 = vand.u32 2147483648, %v1048_v5 }
 0x2a4   : > { %v1192_v50 = vmul.f32 %v1591_v48, %v1191_v43  ;;  %v987_v54 = vadd.f32 %v2133_v59, %v969_v57  ;;  %v1276_v33 = vor.u32 1.1754944e-38, %v1275_v24  ;;  %vm1274_vm2 = vcmp.eq.f32.partialorder %v1273_v31, 8.507059e+37 }
 0x2a5   : > { %vm1209_vm3 = vweird.f32 %v1048_v5  ;;  %vm1214_vm5 = vcmp.eq.f32.partialorder %v1213_v26, 8.507059e+37  ;;  %v1216_v32 = vor.u32 1.1754944e-38, %v1215_v27 }
 0x2a6   : > { %v1595_v9 = vpop.eup %1594  ;;  %v1193_v51 = vadd.f32 %v1591_v48, %v1192_v50  ;;  %v1465_v13 = vmul.f32 -1.442695, %v987_v54 }
 0x2a7   : > { %v1597_v55 = vpop.eup %1596  ;;  %v2193_v12 = vadd.f32 1.0, %v1595_v9 }
 0x2a8   : > { %v1599_v17 = vpop.eup %1598  ;;  %v1197_v18 = vsel %vm1196_vm12, %v1591_v48, %v1193_v51  ;;  %v1265_v21 = vmul.f32 %v1597_v55, %v1052_v2  ;;  %vm1270_vm14 = vweird.f32 %v1597_v55 }
 0x2a9   : > { %v1202_v20 = vsel %vm1199_vm13, %v1201_v11, %v1197_v18  ;;  %1602 = vrcp.f32 %v2193_v12  ;;  %v1601_v14 = vpop.eup %1600  ;;  %v1053_v15 = vadd.f32 1.0, %v1599_v17  ;;  %vm1271_vm0 = vmor %vm1269_vm15, %vm1270_vm14  ;;  %v1230_v34 = vand.u32 2147483648, %v2193_v12 }
 0x2aa   : > { %1303 = vst [vmem:[%s1849_s25 + $0x48] sm:$0xff] %v1202_v20  ;;  %v1266_v59 = vsub.f32 1.0, %v1265_v21  ;;  %1604 = vpow2.f32 %v1465_v13  ;;  %v1205_v39 = vmul.f32 %v1601_v14, %v1048_v5  ;;  %vm1210_vm1 = vweird.f32 %v1601_v14 }
 0x2ab   : > { %1606 = vrcp.f32 %v1053_v15  ;;  %vm1211_vm4 = vmor %vm1209_vm3, %vm1210_vm1  ;;  %v1228_v46 = vand.u32 2147483647, %v2193_v12  ;;  %vm1224_vm7 = vweird.f32 %v2193_v12  ;;  %v1290_v53 = vand.u32 2147483648, %v1053_v15 }
 0x2ac   : > { %v1267_v38 = vmul.f32 %v1597_v55, %v1266_v59  ;;  %v1206_v7 = vsub.f32 1.0, %v1205_v39  ;;  %v1231_v56 = vor.u32 1.1754944e-38, %v1230_v34  ;;  %v1288_v61 = vand.u32 2147483647, %v1053_v15 }
 0x2ad   : > { %vm1229_vm10 = vcmp.eq.f32.partialorder %v1228_v46, 8.507059e+37  ;;  %vm1284_vm11 = vweird.f32 %v1053_v15  ;;  %v1291_v1 = vor.u32 1.1754944e-38, %v1290_v53 }
 0x2ae   : > { %v1268_v25 = vadd.f32 %v1597_v55, %v1267_v38  ;;  %v1207_v10 = vmul.f32 %v1601_v14, %v1206_v7  ;;  %vm1289_vm13 = vcmp.eq.f32.partialorder %v1288_v61, 8.507059e+37 }
 0x2af   : > { %v1603_v30 = vpop.eup %1602 }
 0x2b0   : > { %v1605_v36 = vpop.eup %1604  ;;  %v1272_v16 = vsel %vm1271_vm0, %v1597_v55, %v1268_v25  ;;  %v1220_v28 = vmul.f32 %v1603_v30, %v2193_v12  ;;  %v1208_v37 = vadd.f32 %v1601_v14, %v1207_v10  ;;  %vm1225_vm6 = vweird.f32 %v1603_v30 }
 0x2b1   : > { %v1277_v45 = vsel %vm1274_vm2, %v1276_v33, %v1272_v16  ;;  %v1051_v40 = vadd.f32 1.0, %v1605_v36  ;;  %v1607_v19 = vpop.eup %1606  ;;  %vm1226_vm8 = vmor %vm1224_vm7, %vm1225_vm6 }
 0x2b2   : > { %1308 = vst [vmem:[%s1849_s25 + $0x70] sm:$0xff] %v1277_v45  ;;  %v1221_v44 = vsub.f32 1.0, %v1220_v28  ;;  %v1212_v58 = vsel %vm1211_vm4, %v1601_v14, %v1208_v37  ;;  %v1280_v49 = vmul.f32 %v1607_v19, %v1053_v15  ;;  %vm1285_vm9 = vweird.f32 %v1607_v19 }
 0x2b3   : > { %1608 = vrcp.f32 %v1051_v40  ;;  %v1217_v8 = vsel %vm1214_vm5, %v1216_v32, %v1212_v58  ;;  %vm1286_vm12 = vmor %vm1284_vm11, %vm1285_vm9  ;;  %v1260_v22 = vand.u32 2147483648, %v1051_v40  ;;  %v1258_v4 = vand.u32 2147483647, %v1051_v40 }
 0x2b4   : > { %v1222_v29 = vmul.f32 %v1603_v30, %v1221_v44  ;;  %1304 = vst [vmem:[%s1849_s25 + $0x50] sm:$0xff] %v1217_v8  ;;  %v1281_v41 = vsub.f32 1.0, %v1280_v49  ;;  %vm1254_vm15 = vweird.f32 %v1051_v40 }
 0x2b5   : > { %v1261_v5 = vor.u32 1.1754944e-38, %v1260_v22  ;;  %vm1259_vm1 = vcmp.eq.f32.partialorder %v1258_v4, 8.507059e+37 }
 0x2b6   : > { %v1223_v35 = vadd.f32 %v1603_v30, %v1222_v29  ;;  %v1282_v60 = vmul.f32 %v1607_v19, %v1281_v41 }
 0x2b8   : > { %v1227_v63 = vsel %vm1226_vm8, %v1603_v30, %v1223_v35  ;;  %v1283_v48 = vadd.f32 %v1607_v19, %v1282_v60 }
 0x2b9   : > { %v1609_v0 = vpop.eup %1608  ;;  %v1232_v42 = vsel %vm1229_vm10, %v1231_v56, %v1227_v63 }
 0x2ba   : > { %1305 = vst [vmem:[%s1849_s25 + $0x58] sm:$0xff] %v1232_v42  ;;  %v1250_v2 = vmul.f32 %v1609_v0, %v1051_v40  ;;  %v1287_v62 = vsel %vm1286_vm12, %v1607_v19, %v1283_v48  ;;  %vm1255_vm14 = vweird.f32 %v1609_v0 }
 0x2bb   : > { %v1292_v23 = vsel %vm1289_vm13, %v1291_v1, %v1287_v62  ;;  %vm1256_vm0 = vmor %vm1254_vm15, %vm1255_vm14 }
 0x2bc   : > { %v1251_v3 = vsub.f32 1.0, %v1250_v2  ;;  %1309 = vst [vmem:[%s1849_s25 + $0x78] sm:$0xff] %v1292_v23 }
 0x2be   : > { %v1252_v52 = vmul.f32 %v1609_v0, %v1251_v3 }
 0x2c0   : > { %v1253_v43 = vadd.f32 %v1609_v0, %v1252_v52 }
 0x2c2   : > { %v1257_v6 = vsel %vm1256_vm0, %v1609_v0, %v1253_v43 }
 0x2c3   : > { %v1262_v57 = vsel %vm1259_vm1, %v1261_v5, %v1257_v6 }
 0x2c4   : > { %1307 = vst [vmem:[%s1849_s25 + $0x68] sm:$0xff] %v1262_v57 }
 0x2c5   : > { %1661 = shalt.err (!%p1658_p4)
}
 0x2c6   : > { %s1723_s25 = smov 128   ;;  %s1724_s30 = smov 8  }
 0x2c7   : > { %1482 = dma.vmem_to_hbm [thread:$0]  (%p1834_p5), %s1324_s17, 2048, %s1326_s18, %s1311_s11, %s1723_s25, %s1723_s25, %s1724_s30  }
 0x2c8 PF: > { %p1488_p7 = scmp.ge.s32.totalorder %s1710_s14, 2  ;;  %s1340_s15 = sand.u32 1, %s1698_s0  }
 0x2c9   : > { %s1341_s23 = scalar_lea.sflag [#allocation10], %s1340_s15 }
 0x2ca   : > { %p1485_p8 = pnand %p1488_p7, %p1838_p6 }
 0x2cc   : > { %p1486_p9 = pneg %p1485_p8 }
 0x2ce   : > { %1693 = dma.done.wait (%p1486_p9), %s1341_s23, 2048  }
 0x2cf   : > { %1695 = vsyncadd (%p1486_p9), %s1341_s23, 4294965248  ;;  %s2261_s24 = sld [smem:[#allocation17_spill]]  ;;  %p36_p10 = scmp.ge.s32.totalorder %s1822_s16, 4  }
 0x2d0   : > { %s2262_s0 = smov %s1702_s13  ;;  %s2263_s13 = smov %s1706_s1 }
 0x2d1   : > { %s2265_s14 = smov %s1822_s16  ;;  %38 = sbr.rel (!%p36_p10) target bundleno = 11 (0xb), region = 195 }
 0x2d5   : > { %s2264_s1 = smov %s2261_s24 }
 0x2d6   :  { %1347 = vsyncpa [#allocation10], 1 }
 0x2d7   :  { %1349 = vsyncpa [#allocation10 + $0x1], 1 }
 0x2d8   :  { %1350 = vsyncmov [#allocation4] }
 0x2db   :  { %s1351_s14 = vpop.sfrf %1350 }
 0x2dc   :  { %p1473_p5 = scmp.ne.s32.totalorder %s1351_s14, 0 }
 0x2de   :  { %1355 = shalt.err (%p1473_p5)  }
 0x2df   :  { %1357 = vsyncmov [#allocation4 + $0x1] }
 0x2e2   :  { %s1358_s20 = vpop.sfrf %1357 }
 0x2e3   :  { %p1474_p6 = scmp.ne.s32.totalorder %s1358_s20, 0 }
 0x2e5   :  { %1362 = shalt.err (%p1474_p6)  }

</bundles_post_ra>
